<compile_context>
chip_gen: v6e
topology: v6e:2x2x1
jax: 0.10.0
libtpu: 0.0.40
codegen_flags: <defaults>
</compile_context>

<pallas_src>
import jax
import jax.numpy as jnp
from jax import lax
from jax.experimental import pallas as pl
from jax.experimental.pallas import tpu as pltpu


def lstm_fc_kernel(emb_ref, len_ref, wih_ref, whh_ref, b_ref,
                   wfc_ref, bfc_ref, out_ref, xg_ref):
    """Whole sequence in VMEM; recurrence as an unrolled in-kernel loop."""
    TB, E = emb_ref.shape
    H = whh_ref.shape[0]
    B = len_ref.shape[0]
    T = TB // B

    # (1) One batched MXU matmul for the input projection of every timestep,
    #     bias folded in; result stashed in VMEM scratch.
    xg_ref[...] = (jnp.dot(emb_ref[...], wih_ref[...],
                           preferred_element_type=jnp.float32)
                   + b_ref[...])

    # Hoist loop-invariant loads out of the serial recurrence.
    w_hh = whh_ref[...]            # (H, 4H)
    lengths = len_ref[...]         # (B, 1) int32

    def step(t, carry):
        h_prev, c_prev = carry
        off = pl.multiple_of(t * B, B)            # sublane-aligned row offset
        gates = (xg_ref[pl.ds(off, B), :]
                 + jnp.dot(h_prev, w_hh, preferred_element_type=jnp.float32))
        i_g = jax.nn.sigmoid(gates[:, 0 * H:1 * H])
        f_g = jax.nn.sigmoid(gates[:, 1 * H:2 * H])
        g_g = jnp.tanh(gates[:, 2 * H:3 * H])
        o_g = jax.nn.sigmoid(gates[:, 3 * H:4 * H])
        c_new = f_g * c_prev + i_g * g_g
        h_new = o_g * jnp.tanh(c_new)
        # packed-sequence semantics: freeze state once t >= lengths[b]
        valid = lengths > t                       # (B, 1) broadcasts over H
        return (jnp.where(valid, h_new, h_prev),
                jnp.where(valid, c_new, c_prev))

    h0 = jnp.zeros((B, H), jnp.float32)
    c0 = jnp.zeros((B, H), jnp.float32)
    h_n, _ = lax.fori_loop(0, T, step, (h0, c0), unroll=True)

    # logits = fc(h_n): VPU multiply + lane reduction instead of a 1-wide MXU dot.
    out_ref[...] = (jnp.sum(h_n * wfc_ref[...], axis=-1, keepdims=True)
                    + bfc_ref[...])


def clickbait_forward(x_padded, lengths, params):
    """x_padded: (B, T) int32 token ids; lengths: (B,) int32.

    Returns logits (B, 1) float32, matching ClickbaitNN.forward.
    """
    emb_table, w_ih, w_hh, b_gates, w_fc, b_fc = params
    B, T = x_padded.shape
    E = emb_table.shape[1]
    H = w_hh.shape[0]

    # Glue: embedding gather done time-major directly (row r = t*B + b),
    # avoiding a separate (B,T,E)->(T,B,E) transpose round-trip through HBM.
    emb_tm = jnp.take(emb_table, x_padded.T.reshape(-1), axis=0)   # (T*B, E)
    lengths_col = lengths.reshape(B, 1).astype(jnp.int32)

    grid_spec = pltpu.PrefetchScalarGridSpec(
        num_scalar_prefetch=0,
        grid=(1,),                                     # recurrence folded in-kernel
        in_specs=[
            pl.BlockSpec((T * B, E), lambda i: (0, 0)),    # embeddings (time-major, flat)
            pl.BlockSpec((B, 1), lambda i: (0, 0)),         # lengths
            pl.BlockSpec((E, 4 * H), lambda i: (0, 0)),     # W_ih^T
            pl.BlockSpec((H, 4 * H), lambda i: (0, 0)),     # W_hh^T
            pl.BlockSpec((1, 4 * H), lambda i: (0, 0)),     # b_ih + b_hh
            pl.BlockSpec((1, H), lambda i: (0, 0)),         # W_fc (row)
            pl.BlockSpec((1, 1), lambda i: (0, 0)),         # b_fc
        ],
        out_specs=pl.BlockSpec((B, 1), lambda i: (0, 0)),
        scratch_shapes=[
            pltpu.VMEM((T * B, 4 * H), jnp.float32),        # precomputed x @ W_ih + b
        ],
    )

    return pl.pallas_call(
        lstm_fc_kernel,
        out_shape=jax.ShapeDtypeStruct((B, 1), jnp.float32),
        grid_spec=grid_spec,
        compiler_params=pltpu.CompilerParams(
            dimension_semantics=("arbitrary",)),
    )(emb_tm, lengths_col, w_ih, w_hh, b_gates, w_fc, b_fc)


def make_params(key, vocab_size, embed_dim, hidden_dim):
    """Deterministic synthetic parameters (shapes match nn.Embedding/nn.LSTM/nn.Linear)."""
    ks = jax.random.split(key, 7)
    scale = 0.1
    emb_table = scale * jax.random.normal(ks[0], (vocab_size, embed_dim), jnp.float32)
    # PyTorch LSTM stores weight_ih_l0 as (4H, E); we pre-transpose to (E, 4H).
    w_ih = scale * jax.random.normal(ks[1], (embed_dim, 4 * hidden_dim), jnp.float32)
    w_hh = scale * jax.random.normal(ks[2], (hidden_dim, 4 * hidden_dim), jnp.float32)
    b_ih = scale * jax.random.normal(ks[3], (4 * hidden_dim,), jnp.float32)
    b_hh = scale * jax.random.normal(ks[4], (4 * hidden_dim,), jnp.float32)
    b_gates = (b_ih + b_hh).reshape(1, 4 * hidden_dim)
    # fc weight stored as a (1, H) row for the in-kernel VPU reduction.
    w_fc = scale * jax.random.normal(ks[5], (1, hidden_dim), jnp.float32)
    b_fc = scale * jax.random.normal(ks[6], (1, 1), jnp.float32)
    return emb_table, w_ih, w_hh, b_gates, w_fc, b_fc


def reference_forward(x_padded, lengths, params):
    """Pure-JAX reference replicating embedding + packed LSTM + fc(h_n[-1])."""
    emb_table, w_ih, w_hh, b_gates, w_fc, b_fc = params
    B, T = x_padded.shape
    H = w_hh.shape[0]
    emb = jnp.take(emb_table, x_padded, axis=0)
    h = jnp.zeros((B, H), jnp.float32)
    c = jnp.zeros((B, H), jnp.float32)
    for t in range(T):
        gates = emb[:, t] @ w_ih + h @ w_hh + b_gates
        i_g = jax.nn.sigmoid(gates[:, 0 * H:1 * H])
        f_g = jax.nn.sigmoid(gates[:, 1 * H:2 * H])
        g_g = jnp.tanh(gates[:, 2 * H:3 * H])
        o_g = jax.nn.sigmoid(gates[:, 3 * H:4 * H])
        c_new = f_g * c + i_g * g_g
        h_new = o_g * jnp.tanh(c_new)
        valid = (lengths > t)[:, None]
        h = jnp.where(valid, h_new, h)
        c = jnp.where(valid, c_new, c)
    return h @ w_fc.T + b_fc


if __name__ == "__main__":
    VOCAB, EMBED, HIDDEN = 50, 32, 32
    B, T = 8, 12

    key = jax.random.PRNGKey(0)
    k_params, k_tok, k_len = jax.random.split(key, 3)

    params = make_params(k_params, VOCAB, EMBED, HIDDEN)

    lengths = jax.random.randint(k_len, (B,), 3, T + 1, dtype=jnp.int32)
    x_padded = jax.random.randint(k_tok, (B, T), 0, VOCAB, dtype=jnp.int32)
    # Zero out padded positions (as pad_sequence would with padding_value=0).
    pos = jnp.arange(T)[None, :]
    x_padded = jnp.where(pos < lengths[:, None], x_padded, 0)

    logits = jax.block_until_ready(clickbait_forward(x_padded, lengths, params))
    ref = reference_forward(x_padded, lengths, params)

    assert logits.shape == (B, 1)
    assert jnp.allclose(logits, ref, atol=1e-3, rtol=1e-3), (logits, ref)
    print("KERNEL_OK")
</pallas_src>

<mosaic_0001>
module attributes {stable_mosaic.version = 11 : i64} {
  func.func @lstm_fc_kernel(%arg0: i32, %arg1: memref<96x32xf32, #tpu.memory_space<vmem>>, %arg2: memref<8x1xi32, #tpu.memory_space<vmem>>, %arg3: memref<32x128xf32, #tpu.memory_space<vmem>>, %arg4: memref<32x128xf32, #tpu.memory_space<vmem>>, %arg5: memref<1x128xf32, #tpu.memory_space<vmem>>, %arg6: memref<1x32xf32, #tpu.memory_space<vmem>>, %arg7: memref<1x1xf32, #tpu.memory_space<vmem>>, %arg8: memref<8x1xf32, #tpu.memory_space<vmem>>, %arg9: memref<96x128xf32, #tpu.memory_space<vmem>>) attributes {dimension_semantics = [#tpu.dimension_semantics<arbitrary>], iteration_bounds = array<i64: 1>, scalar_prefetch = 0 : i64, scratch_operands = 1 : i64, tpu.core_type = #tpu.core_type<tc>, window_params = [{pipeline_mode = #tpu.pipeline_mode<synchronous>, transform_indices = @transform_0, window_bounds = array<i64: 96, 32>}, {pipeline_mode = #tpu.pipeline_mode<synchronous>, transform_indices = @transform_1, window_bounds = array<i64: 8, 1>}, {pipeline_mode = #tpu.pipeline_mode<synchronous>, transform_indices = @transform_2, window_bounds = array<i64: 32, 128>}, {pipeline_mode = #tpu.pipeline_mode<synchronous>, transform_indices = @transform_3, window_bounds = array<i64: 32, 128>}, {pipeline_mode = #tpu.pipeline_mode<synchronous>, transform_indices = @transform_4, window_bounds = array<i64: 1, 128>}, {pipeline_mode = #tpu.pipeline_mode<synchronous>, transform_indices = @transform_5, window_bounds = array<i64: 1, 32>}, {pipeline_mode = #tpu.pipeline_mode<synchronous>, transform_indices = @transform_6, window_bounds = array<i64: 1, 1>}, {pipeline_mode = #tpu.pipeline_mode<synchronous>, transform_indices = @transform_7, window_bounds = array<i64: 8, 1>}]} {
    %c0 = arith.constant 0 : index
    %c0_0 = arith.constant 0 : index
    %0 = vector.load %arg1[%c0, %c0_0] : memref<96x32xf32, #tpu.memory_space<vmem>>, vector<96x32xf32>
    %c0_1 = arith.constant 0 : index
    %c0_2 = arith.constant 0 : index
    %1 = vector.load %arg3[%c0_1, %c0_2] : memref<32x128xf32, #tpu.memory_space<vmem>>, vector<32x128xf32>
    %cst = arith.constant dense<0.000000e+00> : vector<96x128xf32>
    %2 = tpu.matmul %0, %1, %cst {dimension_numbers = #tpu.dot_dimension_numbers<[1], [0], [0], [1], [0, 0, 1, 1], [], []>} : vector<96x32xf32>, vector<32x128xf32>, vector<96x128xf32> -> vector<96x128xf32>
    %c0_3 = arith.constant 0 : index
    %c0_4 = arith.constant 0 : index
    %3 = vector.load %arg5[%c0_3, %c0_4] : memref<1x128xf32, #tpu.memory_space<vmem>>, vector<1x128xf32>
    %4 = vector.broadcast %3 : vector<1x128xf32> to vector<96x128xf32>
    %5 = arith.addf %2, %4 : vector<96x128xf32>
    %c0_5 = arith.constant 0 : index
    %c0_6 = arith.constant 0 : index
    %6 = vector.load %arg9[%c0_5, %c0_6] : memref<96x128xf32, #tpu.memory_space<vmem>>, vector<96x128xf32>
    tpu.vector_store %arg9[%c0_5, %c0_6], %5 {strides = array<i32>} : memref<96x128xf32, #tpu.memory_space<vmem>>, vector<96x128xf32>,
    %c0_7 = arith.constant 0 : index
    %c0_8 = arith.constant 0 : index
    %7 = vector.load %arg4[%c0_7, %c0_8] : memref<32x128xf32, #tpu.memory_space<vmem>>, vector<32x128xf32>
    %c0_9 = arith.constant 0 : index
    %c0_10 = arith.constant 0 : index
    %8 = vector.load %arg2[%c0_9, %c0_10] : memref<8x1xi32, #tpu.memory_space<vmem>>, vector<8x1xi32>
    %cst_11 = arith.constant 0.000000e+00 : f32
    %9 = vector.broadcast %cst_11 : f32 to vector<8x32xf32>
    %cst_12 = arith.constant 0.000000e+00 : f32
    %10 = vector.broadcast %cst_12 : f32 to vector<8x32xf32>
    %c0_i32 = arith.constant 0 : i32
    %c8_i32 = arith.constant 8 : i32
    %11 = arith.muli %c0_i32, %c8_i32 : i32
    %12 = tpu.assume_multiple %11, 8 : i32
    %13 = arith.index_cast %12 : i32 to index
    %c0_13 = arith.constant 0 : index
    %14 = vector.load %arg9[%13, %c0_13] : memref<96x128xf32, #tpu.memory_space<vmem>>, vector<8x128xf32>
    %cst_14 = arith.constant dense<0.000000e+00> : vector<8x128xf32>
    %15 = tpu.matmul %9, %7, %cst_14 {dimension_numbers = #tpu.dot_dimension_numbers<[1], [0], [0], [1], [0, 0, 1, 1], [], []>} : vector<8x32xf32>, vector<32x128xf32>, vector<8x128xf32> -> vector<8x128xf32>
    %16 = arith.addf %14, %15 : vector<8x128xf32>
    %17 = vector.extract_strided_slice %16 {offsets = [0, 0], sizes = [8, 32], strides = [1, 1]} : vector<8x128xf32> to vector<8x32xf32>
    %18 = arith.negf %17 : vector<8x32xf32>
    %19 = math.exp %18 : vector<8x32xf32>
    %cst_15 = arith.constant 1.000000e+00 : f32
    %20 = vector.broadcast %cst_15 : f32 to vector<8x32xf32>
    %21 = arith.addf %20, %19 : vector<8x32xf32>
    %22 = arith.divf %20, %21 : vector<8x32xf32>
    %23 = vector.extract_strided_slice %16 {offsets = [0, 32], sizes = [8, 32], strides = [1, 1]} : vector<8x128xf32> to vector<8x32xf32>
    %24 = arith.negf %23 : vector<8x32xf32>
    %25 = math.exp %24 : vector<8x32xf32>
    %cst_16 = arith.constant 1.000000e+00 : f32
    %26 = vector.broadcast %cst_16 : f32 to vector<8x32xf32>
    %27 = arith.addf %26, %25 : vector<8x32xf32>
    %28 = arith.divf %26, %27 : vector<8x32xf32>
    %29 = vector.extract_strided_slice %16 {offsets = [0, 64], sizes = [8, 32], strides = [1, 1]} : vector<8x128xf32> to vector<8x32xf32>
    %30 = math.tanh %29 : vector<8x32xf32>
    %31 = vector.extract_strided_slice %16 {offsets = [0, 96], sizes = [8, 32], strides = [1, 1]} : vector<8x128xf32> to vector<8x32xf32>
    %32 = arith.negf %31 : vector<8x32xf32>
    %33 = math.exp %32 : vector<8x32xf32>
    %cst_17 = arith.constant 1.000000e+00 : f32
    %34 = vector.broadcast %cst_17 : f32 to vector<8x32xf32>
    %35 = arith.addf %34, %33 : vector<8x32xf32>
    %36 = arith.divf %34, %35 : vector<8x32xf32>
    %37 = arith.mulf %28, %10 : vector<8x32xf32>
    %38 = arith.mulf %22, %30 : vector<8x32xf32>
    %39 = arith.addf %37, %38 : vector<8x32xf32>
    %40 = math.tanh %39 : vector<8x32xf32>
    %41 = arith.mulf %36, %40 : vector<8x32xf32>
    %42 = vector.broadcast %c0_i32 : i32 to vector<8x1xi32>
    %43 = arith.cmpi sgt, %8, %42 : vector<8x1xi32>
    %44 = vector.shape_cast %43 : vector<8x1xi1> to vector<8x1xi1>
    %45 = vector.broadcast %44 : vector<8x1xi1> to vector<8x32xi1>
    %46 = arith.select %45, %41, %9 : vector<8x32xi1>, vector<8x32xf32>
    %47 = vector.shape_cast %43 : vector<8x1xi1> to vector<8x1xi1>
    %48 = vector.broadcast %47 : vector<8x1xi1> to vector<8x32xi1>
    %49 = arith.select %48, %39, %10 : vector<8x32xi1>, vector<8x32xf32>
    %c1_i32 = arith.constant 1 : i32
    %c8_i32_18 = arith.constant 8 : i32
    %50 = arith.muli %c1_i32, %c8_i32_18 : i32
    %51 = tpu.assume_multiple %50, 8 : i32
    %52 = arith.index_cast %51 : i32 to index
    %c0_19 = arith.constant 0 : index
    %53 = vector.load %arg9[%52, %c0_19] : memref<96x128xf32, #tpu.memory_space<vmem>>, vector<8x128xf32>
    %cst_20 = arith.constant dense<0.000000e+00> : vector<8x128xf32>
    %54 = tpu.matmul %46, %7, %cst_20 {dimension_numbers = #tpu.dot_dimension_numbers<[1], [0], [0], [1], [0, 0, 1, 1], [], []>} : vector<8x32xf32>, vector<32x128xf32>, vector<8x128xf32> -> vector<8x128xf32>
    %55 = arith.addf %53, %54 : vector<8x128xf32>
    %56 = vector.extract_strided_slice %55 {offsets = [0, 0], sizes = [8, 32], strides = [1, 1]} : vector<8x128xf32> to vector<8x32xf32>
    %57 = arith.negf %56 : vector<8x32xf32>
    %58 = math.exp %57 : vector<8x32xf32>
    %cst_21 = arith.constant 1.000000e+00 : f32
    %59 = vector.broadcast %cst_21 : f32 to vector<8x32xf32>
    %60 = arith.addf %59, %58 : vector<8x32xf32>
    %61 = arith.divf %59, %60 : vector<8x32xf32>
    %62 = vector.extract_strided_slice %55 {offsets = [0, 32], sizes = [8, 32], strides = [1, 1]} : vector<8x128xf32> to vector<8x32xf32>
    %63 = arith.negf %62 : vector<8x32xf32>
    %64 = math.exp %63 : vector<8x32xf32>
    %cst_22 = arith.constant 1.000000e+00 : f32
    %65 = vector.broadcast %cst_22 : f32 to vector<8x32xf32>
    %66 = arith.addf %65, %64 : vector<8x32xf32>
    %67 = arith.divf %65, %66 : vector<8x32xf32>
    %68 = vector.extract_strided_slice %55 {offsets = [0, 64], sizes = [8, 32], strides = [1, 1]} : vector<8x128xf32> to vector<8x32xf32>
    %69 = math.tanh %68 : vector<8x32xf32>
    %70 = vector.extract_strided_slice %55 {offsets = [0, 96], sizes = [8, 32], strides = [1, 1]} : vector<8x128xf32> to vector<8x32xf32>
    %71 = arith.negf %70 : vector<8x32xf32>
    %72 = math.exp %71 : vector<8x32xf32>
    %cst_23 = arith.constant 1.000000e+00 : f32
    %73 = vector.broadcast %cst_23 : f32 to vector<8x32xf32>
    %74 = arith.addf %73, %72 : vector<8x32xf32>
    %75 = arith.divf %73, %74 : vector<8x32xf32>
    %76 = arith.mulf %67, %49 : vector<8x32xf32>
    %77 = arith.mulf %61, %69 : vector<8x32xf32>
    %78 = arith.addf %76, %77 : vector<8x32xf32>
    %79 = math.tanh %78 : vector<8x32xf32>
    %80 = arith.mulf %75, %79 : vector<8x32xf32>
    %81 = vector.broadcast %c1_i32 : i32 to vector<8x1xi32>
    %82 = arith.cmpi sgt, %8, %81 : vector<8x1xi32>
    %83 = vector.shape_cast %82 : vector<8x1xi1> to vector<8x1xi1>
    %84 = vector.broadcast %83 : vector<8x1xi1> to vector<8x32xi1>
    %85 = arith.select %84, %80, %46 : vector<8x32xi1>, vector<8x32xf32>
    %86 = vector.shape_cast %82 : vector<8x1xi1> to vector<8x1xi1>
    %87 = vector.broadcast %86 : vector<8x1xi1> to vector<8x32xi1>
    %88 = arith.select %87, %78, %49 : vector<8x32xi1>, vector<8x32xf32>
    %c2_i32 = arith.constant 2 : i32
    %c8_i32_24 = arith.constant 8 : i32
    %89 = arith.muli %c2_i32, %c8_i32_24 : i32
    %90 = tpu.assume_multiple %89, 8 : i32
    %91 = arith.index_cast %90 : i32 to index
    %c0_25 = arith.constant 0 : index
    %92 = vector.load %arg9[%91, %c0_25] : memref<96x128xf32, #tpu.memory_space<vmem>>, vector<8x128xf32>
    %cst_26 = arith.constant dense<0.000000e+00> : vector<8x128xf32>
    %93 = tpu.matmul %85, %7, %cst_26 {dimension_numbers = #tpu.dot_dimension_numbers<[1], [0], [0], [1], [0, 0, 1, 1], [], []>} : vector<8x32xf32>, vector<32x128xf32>, vector<8x128xf32> -> vector<8x128xf32>
    %94 = arith.addf %92, %93 : vector<8x128xf32>
    %95 = vector.extract_strided_slice %94 {offsets = [0, 0], sizes = [8, 32], strides = [1, 1]} : vector<8x128xf32> to vector<8x32xf32>
    %96 = arith.negf %95 : vector<8x32xf32>
    %97 = math.exp %96 : vector<8x32xf32>
    %cst_27 = arith.constant 1.000000e+00 : f32
    %98 = vector.broadcast %cst_27 : f32 to vector<8x32xf32>
    %99 = arith.addf %98, %97 : vector<8x32xf32>
    %100 = arith.divf %98, %99 : vector<8x32xf32>
    %101 = vector.extract_strided_slice %94 {offsets = [0, 32], sizes = [8, 32], strides = [1, 1]} : vector<8x128xf32> to vector<8x32xf32>
    %102 = arith.negf %101 : vector<8x32xf32>
    %103 = math.exp %102 : vector<8x32xf32>
    %cst_28 = arith.constant 1.000000e+00 : f32
    %104 = vector.broadcast %cst_28 : f32 to vector<8x32xf32>
    %105 = arith.addf %104, %103 : vector<8x32xf32>
    %106 = arith.divf %104, %105 : vector<8x32xf32>
    %107 = vector.extract_strided_slice %94 {offsets = [0, 64], sizes = [8, 32], strides = [1, 1]} : vector<8x128xf32> to vector<8x32xf32>
    %108 = math.tanh %107 : vector<8x32xf32>
    %109 = vector.extract_strided_slice %94 {offsets = [0, 96], sizes = [8, 32], strides = [1, 1]} : vector<8x128xf32> to vector<8x32xf32>
    %110 = arith.negf %109 : vector<8x32xf32>
    %111 = math.exp %110 : vector<8x32xf32>
    %cst_29 = arith.constant 1.000000e+00 : f32
    %112 = vector.broadcast %cst_29 : f32 to vector<8x32xf32>
    %113 = arith.addf %112, %111 : vector<8x32xf32>
    %114 = arith.divf %112, %113 : vector<8x32xf32>
    %115 = arith.mulf %106, %88 : vector<8x32xf32>
    %116 = arith.mulf %100, %108 : vector<8x32xf32>
    %117 = arith.addf %115, %116 : vector<8x32xf32>
    %118 = math.tanh %117 : vector<8x32xf32>
    %119 = arith.mulf %114, %118 : vector<8x32xf32>
    %120 = vector.broadcast %c2_i32 : i32 to vector<8x1xi32>
    %121 = arith.cmpi sgt, %8, %120 : vector<8x1xi32>
    %122 = vector.shape_cast %121 : vector<8x1xi1> to vector<8x1xi1>
    %123 = vector.broadcast %122 : vector<8x1xi1> to vector<8x32xi1>
    %124 = arith.select %123, %119, %85 : vector<8x32xi1>, vector<8x32xf32>
    %125 = vector.shape_cast %121 : vector<8x1xi1> to vector<8x1xi1>
    %126 = vector.broadcast %125 : vector<8x1xi1> to vector<8x32xi1>
    %127 = arith.select %126, %117, %88 : vector<8x32xi1>, vector<8x32xf32>
    %c3_i32 = arith.constant 3 : i32
    %c8_i32_30 = arith.constant 8 : i32
    %128 = arith.muli %c3_i32, %c8_i32_30 : i32
    %129 = tpu.assume_multiple %128, 8 : i32
    %130 = arith.index_cast %129 : i32 to index
    %c0_31 = arith.constant 0 : index
    %131 = vector.load %arg9[%130, %c0_31] : memref<96x128xf32, #tpu.memory_space<vmem>>, vector<8x128xf32>
    %cst_32 = arith.constant dense<0.000000e+00> : vector<8x128xf32>
    %132 = tpu.matmul %124, %7, %cst_32 {dimension_numbers = #tpu.dot_dimension_numbers<[1], [0], [0], [1], [0, 0, 1, 1], [], []>} : vector<8x32xf32>, vector<32x128xf32>, vector<8x128xf32> -> vector<8x128xf32>
    %133 = arith.addf %131, %132 : vector<8x128xf32>
    %134 = vector.extract_strided_slice %133 {offsets = [0, 0], sizes = [8, 32], strides = [1, 1]} : vector<8x128xf32> to vector<8x32xf32>
    %135 = arith.negf %134 : vector<8x32xf32>
    %136 = math.exp %135 : vector<8x32xf32>
    %cst_33 = arith.constant 1.000000e+00 : f32
    %137 = vector.broadcast %cst_33 : f32 to vector<8x32xf32>
    %138 = arith.addf %137, %136 : vector<8x32xf32>
    %139 = arith.divf %137, %138 : vector<8x32xf32>
    %140 = vector.extract_strided_slice %133 {offsets = [0, 32], sizes = [8, 32], strides = [1, 1]} : vector<8x128xf32> to vector<8x32xf32>
    %141 = arith.negf %140 : vector<8x32xf32>
    %142 = math.exp %141 : vector<8x32xf32>
    %cst_34 = arith.constant 1.000000e+00 : f32
    %143 = vector.broadcast %cst_34 : f32 to vector<8x32xf32>
    %144 = arith.addf %143, %142 : vector<8x32xf32>
    %145 = arith.divf %143, %144 : vector<8x32xf32>
    %146 = vector.extract_strided_slice %133 {offsets = [0, 64], sizes = [8, 32], strides = [1, 1]} : vector<8x128xf32> to vector<8x32xf32>
    %147 = math.tanh %146 : vector<8x32xf32>
    %148 = vector.extract_strided_slice %133 {offsets = [0, 96], sizes = [8, 32], strides = [1, 1]} : vector<8x128xf32> to vector<8x32xf32>
    %149 = arith.negf %148 : vector<8x32xf32>
    %150 = math.exp %149 : vector<8x32xf32>
    %cst_35 = arith.constant 1.000000e+00 : f32
    %151 = vector.broadcast %cst_35 : f32 to vector<8x32xf32>
    %152 = arith.addf %151, %150 : vector<8x32xf32>
    %153 = arith.divf %151, %152 : vector<8x32xf32>
    %154 = arith.mulf %145, %127 : vector<8x32xf32>
    %155 = arith.mulf %139, %147 : vector<8x32xf32>
    %156 = arith.addf %154, %155 : vector<8x32xf32>
    %157 = math.tanh %156 : vector<8x32xf32>
    %158 = arith.mulf %153, %157 : vector<8x32xf32>
    %159 = vector.broadcast %c3_i32 : i32 to vector<8x1xi32>
    %160 = arith.cmpi sgt, %8, %159 : vector<8x1xi32>
    %161 = vector.shape_cast %160 : vector<8x1xi1> to vector<8x1xi1>
    %162 = vector.broadcast %161 : vector<8x1xi1> to vector<8x32xi1>
    %163 = arith.select %162, %158, %124 : vector<8x32xi1>, vector<8x32xf32>
    %164 = vector.shape_cast %160 : vector<8x1xi1> to vector<8x1xi1>
    %165 = vector.broadcast %164 : vector<8x1xi1> to vector<8x32xi1>
    %166 = arith.select %165, %156, %127 : vector<8x32xi1>, vector<8x32xf32>
    %c4_i32 = arith.constant 4 : i32
    %c8_i32_36 = arith.constant 8 : i32
    %167 = arith.muli %c4_i32, %c8_i32_36 : i32
    %168 = tpu.assume_multiple %167, 8 : i32
    %169 = arith.index_cast %168 : i32 to index
    %c0_37 = arith.constant 0 : index
    %170 = vector.load %arg9[%169, %c0_37] : memref<96x128xf32, #tpu.memory_space<vmem>>, vector<8x128xf32>
    %cst_38 = arith.constant dense<0.000000e+00> : vector<8x128xf32>
    %171 = tpu.matmul %163, %7, %cst_38 {dimension_numbers = #tpu.dot_dimension_numbers<[1], [0], [0], [1], [0, 0, 1, 1], [], []>} : vector<8x32xf32>, vector<32x128xf32>, vector<8x128xf32> -> vector<8x128xf32>
    %172 = arith.addf %170, %171 : vector<8x128xf32>
    %173 = vector.extract_strided_slice %172 {offsets = [0, 0], sizes = [8, 32], strides = [1, 1]} : vector<8x128xf32> to vector<8x32xf32>
    %174 = arith.negf %173 : vector<8x32xf32>
    %175 = math.exp %174 : vector<8x32xf32>
    %cst_39 = arith.constant 1.000000e+00 : f32
    %176 = vector.broadcast %cst_39 : f32 to vector<8x32xf32>
    %177 = arith.addf %176, %175 : vector<8x32xf32>
    %178 = arith.divf %176, %177 : vector<8x32xf32>
    %179 = vector.extract_strided_slice %172 {offsets = [0, 32], sizes = [8, 32], strides = [1, 1]} : vector<8x128xf32> to vector<8x32xf32>
    %180 = arith.negf %179 : vector<8x32xf32>
    %181 = math.exp %180 : vector<8x32xf32>
    %cst_40 = arith.constant 1.000000e+00 : f32
    %182 = vector.broadcast %cst_40 : f32 to vector<8x32xf32>
    %183 = arith.addf %182, %181 : vector<8x32xf32>
    %184 = arith.divf %182, %183 : vector<8x32xf32>
    %185 = vector.extract_strided_slice %172 {offsets = [0, 64], sizes = [8, 32], strides = [1, 1]} : vector<8x128xf32> to vector<8x32xf32>
    %186 = math.tanh %185 : vector<8x32xf32>
    %187 = vector.extract_strided_slice %172 {offsets = [0, 96], sizes = [8, 32], strides = [1, 1]} : vector<8x128xf32> to vector<8x32xf32>
    %188 = arith.negf %187 : vector<8x32xf32>
    %189 = math.exp %188 : vector<8x32xf32>
    %cst_41 = arith.constant 1.000000e+00 : f32
    %190 = vector.broadcast %cst_41 : f32 to vector<8x32xf32>
    %191 = arith.addf %190, %189 : vector<8x32xf32>
    %192 = arith.divf %190, %191 : vector<8x32xf32>
    %193 = arith.mulf %184, %166 : vector<8x32xf32>
    %194 = arith.mulf %178, %186 : vector<8x32xf32>
    %195 = arith.addf %193, %194 : vector<8x32xf32>
    %196 = math.tanh %195 : vector<8x32xf32>
    %197 = arith.mulf %192, %196 : vector<8x32xf32>
    %198 = vector.broadcast %c4_i32 : i32 to vector<8x1xi32>
    %199 = arith.cmpi sgt, %8, %198 : vector<8x1xi32>
    %200 = vector.shape_cast %199 : vector<8x1xi1> to vector<8x1xi1>
    %201 = vector.broadcast %200 : vector<8x1xi1> to vector<8x32xi1>
    %202 = arith.select %201, %197, %163 : vector<8x32xi1>, vector<8x32xf32>
    %203 = vector.shape_cast %199 : vector<8x1xi1> to vector<8x1xi1>
    %204 = vector.broadcast %203 : vector<8x1xi1> to vector<8x32xi1>
    %205 = arith.select %204, %195, %166 : vector<8x32xi1>, vector<8x32xf32>
    %c5_i32 = arith.constant 5 : i32
    %c8_i32_42 = arith.constant 8 : i32
    %206 = arith.muli %c5_i32, %c8_i32_42 : i32
    %207 = tpu.assume_multiple %206, 8 : i32
    %208 = arith.index_cast %207 : i32 to index
    %c0_43 = arith.constant 0 : index
    %209 = vector.load %arg9[%208, %c0_43] : memref<96x128xf32, #tpu.memory_space<vmem>>, vector<8x128xf32>
    %cst_44 = arith.constant dense<0.000000e+00> : vector<8x128xf32>
    %210 = tpu.matmul %202, %7, %cst_44 {dimension_numbers = #tpu.dot_dimension_numbers<[1], [0], [0], [1], [0, 0, 1, 1], [], []>} : vector<8x32xf32>, vector<32x128xf32>, vector<8x128xf32> -> vector<8x128xf32>
    %211 = arith.addf %209, %210 : vector<8x128xf32>
    %212 = vector.extract_strided_slice %211 {offsets = [0, 0], sizes = [8, 32], strides = [1, 1]} : vector<8x128xf32> to vector<8x32xf32>
    %213 = arith.negf %212 : vector<8x32xf32>
    %214 = math.exp %213 : vector<8x32xf32>
    %cst_45 = arith.constant 1.000000e+00 : f32
    %215 = vector.broadcast %cst_45 : f32 to vector<8x32xf32>
    %216 = arith.addf %215, %214 : vector<8x32xf32>
    %217 = arith.divf %215, %216 : vector<8x32xf32>
    %218 = vector.extract_strided_slice %211 {offsets = [0, 32], sizes = [8, 32], strides = [1, 1]} : vector<8x128xf32> to vector<8x32xf32>
    %219 = arith.negf %218 : vector<8x32xf32>
    %220 = math.exp %219 : vector<8x32xf32>
    %cst_46 = arith.constant 1.000000e+00 : f32
    %221 = vector.broadcast %cst_46 : f32 to vector<8x32xf32>
    %222 = arith.addf %221, %220 : vector<8x32xf32>
    %223 = arith.divf %221, %222 : vector<8x32xf32>
    %224 = vector.extract_strided_slice %211 {offsets = [0, 64], sizes = [8, 32], strides = [1, 1]} : vector<8x128xf32> to vector<8x32xf32>
    %225 = math.tanh %224 : vector<8x32xf32>
    %226 = vector.extract_strided_slice %211 {offsets = [0, 96], sizes = [8, 32], strides = [1, 1]} : vector<8x128xf32> to vector<8x32xf32>
    %227 = arith.negf %226 : vector<8x32xf32>
    %228 = math.exp %227 : vector<8x32xf32>
    %cst_47 = arith.constant 1.000000e+00 : f32
    %229 = vector.broadcast %cst_47 : f32 to vector<8x32xf32>
    %230 = arith.addf %229, %228 : vector<8x32xf32>
    %231 = arith.divf %229, %230 : vector<8x32xf32>
    %232 = arith.mulf %223, %205 : vector<8x32xf32>
    %233 = arith.mulf %217, %225 : vector<8x32xf32>
    %234 = arith.addf %232, %233 : vector<8x32xf32>
    %235 = math.tanh %234 : vector<8x32xf32>
    %236 = arith.mulf %231, %235 : vector<8x32xf32>
    %237 = vector.broadcast %c5_i32 : i32 to vector<8x1xi32>
    %238 = arith.cmpi sgt, %8, %237 : vector<8x1xi32>
    %239 = vector.shape_cast %238 : vector<8x1xi1> to vector<8x1xi1>
    %240 = vector.broadcast %239 : vector<8x1xi1> to vector<8x32xi1>
    %241 = arith.select %240, %236, %202 : vector<8x32xi1>, vector<8x32xf32>
    %242 = vector.shape_cast %238 : vector<8x1xi1> to vector<8x1xi1>
    %243 = vector.broadcast %242 : vector<8x1xi1> to vector<8x32xi1>
    %244 = arith.select %243, %234, %205 : vector<8x32xi1>, vector<8x32xf32>
    %c6_i32 = arith.constant 6 : i32
    %c8_i32_48 = arith.constant 8 : i32
    %245 = arith.muli %c6_i32, %c8_i32_48 : i32
    %246 = tpu.assume_multiple %245, 8 : i32
    %247 = arith.index_cast %246 : i32 to index
    %c0_49 = arith.constant 0 : index
    %248 = vector.load %arg9[%247, %c0_49] : memref<96x128xf32, #tpu.memory_space<vmem>>, vector<8x128xf32>
    %cst_50 = arith.constant dense<0.000000e+00> : vector<8x128xf32>
    %249 = tpu.matmul %241, %7, %cst_50 {dimension_numbers = #tpu.dot_dimension_numbers<[1], [0], [0], [1], [0, 0, 1, 1], [], []>} : vector<8x32xf32>, vector<32x128xf32>, vector<8x128xf32> -> vector<8x128xf32>
    %250 = arith.addf %248, %249 : vector<8x128xf32>
    %251 = vector.extract_strided_slice %250 {offsets = [0, 0], sizes = [8, 32], strides = [1, 1]} : vector<8x128xf32> to vector<8x32xf32>
    %252 = arith.negf %251 : vector<8x32xf32>
    %253 = math.exp %252 : vector<8x32xf32>
    %cst_51 = arith.constant 1.000000e+00 : f32
    %254 = vector.broadcast %cst_51 : f32 to vector<8x32xf32>
    %255 = arith.addf %254, %253 : vector<8x32xf32>
    %256 = arith.divf %254, %255 : vector<8x32xf32>
    %257 = vector.extract_strided_slice %250 {offsets = [0, 32], sizes = [8, 32], strides = [1, 1]} : vector<8x128xf32> to vector<8x32xf32>
    %258 = arith.negf %257 : vector<8x32xf32>
    %259 = math.exp %258 : vector<8x32xf32>
    %cst_52 = arith.constant 1.000000e+00 : f32
    %260 = vector.broadcast %cst_52 : f32 to vector<8x32xf32>
    %261 = arith.addf %260, %259 : vector<8x32xf32>
    %262 = arith.divf %260, %261 : vector<8x32xf32>
    %263 = vector.extract_strided_slice %250 {offsets = [0, 64], sizes = [8, 32], strides = [1, 1]} : vector<8x128xf32> to vector<8x32xf32>
    %264 = math.tanh %263 : vector<8x32xf32>
    %265 = vector.extract_strided_slice %250 {offsets = [0, 96], sizes = [8, 32], strides = [1, 1]} : vector<8x128xf32> to vector<8x32xf32>
    %266 = arith.negf %265 : vector<8x32xf32>
    %267 = math.exp %266 : vector<8x32xf32>
    %cst_53 = arith.constant 1.000000e+00 : f32
    %268 = vector.broadcast %cst_53 : f32 to vector<8x32xf32>
    %269 = arith.addf %268, %267 : vector<8x32xf32>
    %270 = arith.divf %268, %269 : vector<8x32xf32>
    %271 = arith.mulf %262, %244 : vector<8x32xf32>
    %272 = arith.mulf %256, %264 : vector<8x32xf32>
    %273 = arith.addf %271, %272 : vector<8x32xf32>
    %274 = math.tanh %273 : vector<8x32xf32>
    %275 = arith.mulf %270, %274 : vector<8x32xf32>
    %276 = vector.broadcast %c6_i32 : i32 to vector<8x1xi32>
    %277 = arith.cmpi sgt, %8, %276 : vector<8x1xi32>
    %278 = vector.shape_cast %277 : vector<8x1xi1> to vector<8x1xi1>
    %279 = vector.broadcast %278 : vector<8x1xi1> to vector<8x32xi1>
    %280 = arith.select %279, %275, %241 : vector<8x32xi1>, vector<8x32xf32>
    %281 = vector.shape_cast %277 : vector<8x1xi1> to vector<8x1xi1>
    %282 = vector.broadcast %281 : vector<8x1xi1> to vector<8x32xi1>
    %283 = arith.select %282, %273, %244 : vector<8x32xi1>, vector<8x32xf32>
    %c7_i32 = arith.constant 7 : i32
    %c8_i32_54 = arith.constant 8 : i32
    %284 = arith.muli %c7_i32, %c8_i32_54 : i32
    %285 = tpu.assume_multiple %284, 8 : i32
    %286 = arith.index_cast %285 : i32 to index
    %c0_55 = arith.constant 0 : index
    %287 = vector.load %arg9[%286, %c0_55] : memref<96x128xf32, #tpu.memory_space<vmem>>, vector<8x128xf32>
    %cst_56 = arith.constant dense<0.000000e+00> : vector<8x128xf32>
    %288 = tpu.matmul %280, %7, %cst_56 {dimension_numbers = #tpu.dot_dimension_numbers<[1], [0], [0], [1], [0, 0, 1, 1], [], []>} : vector<8x32xf32>, vector<32x128xf32>, vector<8x128xf32> -> vector<8x128xf32>
    %289 = arith.addf %287, %288 : vector<8x128xf32>
    %290 = vector.extract_strided_slice %289 {offsets = [0, 0], sizes = [8, 32], strides = [1, 1]} : vector<8x128xf32> to vector<8x32xf32>
    %291 = arith.negf %290 : vector<8x32xf32>
    %292 = math.exp %291 : vector<8x32xf32>
    %cst_57 = arith.constant 1.000000e+00 : f32
    %293 = vector.broadcast %cst_57 : f32 to vector<8x32xf32>
    %294 = arith.addf %293, %292 : vector<8x32xf32>
    %295 = arith.divf %293, %294 : vector<8x32xf32>
    %296 = vector.extract_strided_slice %289 {offsets = [0, 32], sizes = [8, 32], strides = [1, 1]} : vector<8x128xf32> to vector<8x32xf32>
    %297 = arith.negf %296 : vector<8x32xf32>
    %298 = math.exp %297 : vector<8x32xf32>
    %cst_58 = arith.constant 1.000000e+00 : f32
    %299 = vector.broadcast %cst_58 : f32 to vector<8x32xf32>
    %300 = arith.addf %299, %298 : vector<8x32xf32>
    %301 = arith.divf %299, %300 : vector<8x32xf32>
    %302 = vector.extract_strided_slice %289 {offsets = [0, 64], sizes = [8, 32], strides = [1, 1]} : vector<8x128xf32> to vector<8x32xf32>
    %303 = math.tanh %302 : vector<8x32xf32>
    %304 = vector.extract_strided_slice %289 {offsets = [0, 96], sizes = [8, 32], strides = [1, 1]} : vector<8x128xf32> to vector<8x32xf32>
    %305 = arith.negf %304 : vector<8x32xf32>
    %306 = math.exp %305 : vector<8x32xf32>
    %cst_59 = arith.constant 1.000000e+00 : f32
    %307 = vector.broadcast %cst_59 : f32 to vector<8x32xf32>
    %308 = arith.addf %307, %306 : vector<8x32xf32>
    %309 = arith.divf %307, %308 : vector<8x32xf32>
    %310 = arith.mulf %301, %283 : vector<8x32xf32>
    %311 = arith.mulf %295, %303 : vector<8x32xf32>
    %312 = arith.addf %310, %311 : vector<8x32xf32>
    %313 = math.tanh %312 : vector<8x32xf32>
    %314 = arith.mulf %309, %313 : vector<8x32xf32>
    %315 = vector.broadcast %c7_i32 : i32 to vector<8x1xi32>
    %316 = arith.cmpi sgt, %8, %315 : vector<8x1xi32>
    %317 = vector.shape_cast %316 : vector<8x1xi1> to vector<8x1xi1>
    %318 = vector.broadcast %317 : vector<8x1xi1> to vector<8x32xi1>
    %319 = arith.select %318, %314, %280 : vector<8x32xi1>, vector<8x32xf32>
    %320 = vector.shape_cast %316 : vector<8x1xi1> to vector<8x1xi1>
    %321 = vector.broadcast %320 : vector<8x1xi1> to vector<8x32xi1>
    %322 = arith.select %321, %312, %283 : vector<8x32xi1>, vector<8x32xf32>
    %c8_i32_60 = arith.constant 8 : i32
    %c8_i32_61 = arith.constant 8 : i32
    %323 = arith.muli %c8_i32_60, %c8_i32_61 : i32
    %324 = tpu.assume_multiple %323, 8 : i32
    %325 = arith.index_cast %324 : i32 to index
    %c0_62 = arith.constant 0 : index
    %326 = vector.load %arg9[%325, %c0_62] : memref<96x128xf32, #tpu.memory_space<vmem>>, vector<8x128xf32>
    %cst_63 = arith.constant dense<0.000000e+00> : vector<8x128xf32>
    %327 = tpu.matmul %319, %7, %cst_63 {dimension_numbers = #tpu.dot_dimension_numbers<[1], [0], [0], [1], [0, 0, 1, 1], [], []>} : vector<8x32xf32>, vector<32x128xf32>, vector<8x128xf32> -> vector<8x128xf32>
    %328 = arith.addf %326, %327 : vector<8x128xf32>
    %329 = vector.extract_strided_slice %328 {offsets = [0, 0], sizes = [8, 32], strides = [1, 1]} : vector<8x128xf32> to vector<8x32xf32>
    %330 = arith.negf %329 : vector<8x32xf32>
    %331 = math.exp %330 : vector<8x32xf32>
    %cst_64 = arith.constant 1.000000e+00 : f32
    %332 = vector.broadcast %cst_64 : f32 to vector<8x32xf32>
    %333 = arith.addf %332, %331 : vector<8x32xf32>
    %334 = arith.divf %332, %333 : vector<8x32xf32>
    %335 = vector.extract_strided_slice %328 {offsets = [0, 32], sizes = [8, 32], strides = [1, 1]} : vector<8x128xf32> to vector<8x32xf32>
    %336 = arith.negf %335 : vector<8x32xf32>
    %337 = math.exp %336 : vector<8x32xf32>
    %cst_65 = arith.constant 1.000000e+00 : f32
    %338 = vector.broadcast %cst_65 : f32 to vector<8x32xf32>
    %339 = arith.addf %338, %337 : vector<8x32xf32>
    %340 = arith.divf %338, %339 : vector<8x32xf32>
    %341 = vector.extract_strided_slice %328 {offsets = [0, 64], sizes = [8, 32], strides = [1, 1]} : vector<8x128xf32> to vector<8x32xf32>
    %342 = math.tanh %341 : vector<8x32xf32>
    %343 = vector.extract_strided_slice %328 {offsets = [0, 96], sizes = [8, 32], strides = [1, 1]} : vector<8x128xf32> to vector<8x32xf32>
    %344 = arith.negf %343 : vector<8x32xf32>
    %345 = math.exp %344 : vector<8x32xf32>
    %cst_66 = arith.constant 1.000000e+00 : f32
    %346 = vector.broadcast %cst_66 : f32 to vector<8x32xf32>
    %347 = arith.addf %346, %345 : vector<8x32xf32>
    %348 = arith.divf %346, %347 : vector<8x32xf32>
    %349 = arith.mulf %340, %322 : vector<8x32xf32>
    %350 = arith.mulf %334, %342 : vector<8x32xf32>
    %351 = arith.addf %349, %350 : vector<8x32xf32>
    %352 = math.tanh %351 : vector<8x32xf32>
    %353 = arith.mulf %348, %352 : vector<8x32xf32>
    %354 = vector.broadcast %c8_i32_60 : i32 to vector<8x1xi32>
    %355 = arith.cmpi sgt, %8, %354 : vector<8x1xi32>
    %356 = vector.shape_cast %355 : vector<8x1xi1> to vector<8x1xi1>
    %357 = vector.broadcast %356 : vector<8x1xi1> to vector<8x32xi1>
    %358 = arith.select %357, %353, %319 : vector<8x32xi1>, vector<8x32xf32>
    %359 = vector.shape_cast %355 : vector<8x1xi1> to vector<8x1xi1>
    %360 = vector.broadcast %359 : vector<8x1xi1> to vector<8x32xi1>
    %361 = arith.select %360, %351, %322 : vector<8x32xi1>, vector<8x32xf32>
    %c9_i32 = arith.constant 9 : i32
    %c8_i32_67 = arith.constant 8 : i32
    %362 = arith.muli %c9_i32, %c8_i32_67 : i32
    %363 = tpu.assume_multiple %362, 8 : i32
    %364 = arith.index_cast %363 : i32 to index
    %c0_68 = arith.constant 0 : index
    %365 = vector.load %arg9[%364, %c0_68] : memref<96x128xf32, #tpu.memory_space<vmem>>, vector<8x128xf32>
    %cst_69 = arith.constant dense<0.000000e+00> : vector<8x128xf32>
    %366 = tpu.matmul %358, %7, %cst_69 {dimension_numbers = #tpu.dot_dimension_numbers<[1], [0], [0], [1], [0, 0, 1, 1], [], []>} : vector<8x32xf32>, vector<32x128xf32>, vector<8x128xf32> -> vector<8x128xf32>
    %367 = arith.addf %365, %366 : vector<8x128xf32>
    %368 = vector.extract_strided_slice %367 {offsets = [0, 0], sizes = [8, 32], strides = [1, 1]} : vector<8x128xf32> to vector<8x32xf32>
    %369 = arith.negf %368 : vector<8x32xf32>
    %370 = math.exp %369 : vector<8x32xf32>
    %cst_70 = arith.constant 1.000000e+00 : f32
    %371 = vector.broadcast %cst_70 : f32 to vector<8x32xf32>
    %372 = arith.addf %371, %370 : vector<8x32xf32>
    %373 = arith.divf %371, %372 : vector<8x32xf32>
    %374 = vector.extract_strided_slice %367 {offsets = [0, 32], sizes = [8, 32], strides = [1, 1]} : vector<8x128xf32> to vector<8x32xf32>
    %375 = arith.negf %374 : vector<8x32xf32>
    %376 = math.exp %375 : vector<8x32xf32>
    %cst_71 = arith.constant 1.000000e+00 : f32
    %377 = vector.broadcast %cst_71 : f32 to vector<8x32xf32>
    %378 = arith.addf %377, %376 : vector<8x32xf32>
    %379 = arith.divf %377, %378 : vector<8x32xf32>
    %380 = vector.extract_strided_slice %367 {offsets = [0, 64], sizes = [8, 32], strides = [1, 1]} : vector<8x128xf32> to vector<8x32xf32>
    %381 = math.tanh %380 : vector<8x32xf32>
    %382 = vector.extract_strided_slice %367 {offsets = [0, 96], sizes = [8, 32], strides = [1, 1]} : vector<8x128xf32> to vector<8x32xf32>
    %383 = arith.negf %382 : vector<8x32xf32>
    %384 = math.exp %383 : vector<8x32xf32>
    %cst_72 = arith.constant 1.000000e+00 : f32
    %385 = vector.broadcast %cst_72 : f32 to vector<8x32xf32>
    %386 = arith.addf %385, %384 : vector<8x32xf32>
    %387 = arith.divf %385, %386 : vector<8x32xf32>
    %388 = arith.mulf %379, %361 : vector<8x32xf32>
    %389 = arith.mulf %373, %381 : vector<8x32xf32>
    %390 = arith.addf %388, %389 : vector<8x32xf32>
    %391 = math.tanh %390 : vector<8x32xf32>
    %392 = arith.mulf %387, %391 : vector<8x32xf32>
    %393 = vector.broadcast %c9_i32 : i32 to vector<8x1xi32>
    %394 = arith.cmpi sgt, %8, %393 : vector<8x1xi32>
    %395 = vector.shape_cast %394 : vector<8x1xi1> to vector<8x1xi1>
    %396 = vector.broadcast %395 : vector<8x1xi1> to vector<8x32xi1>
    %397 = arith.select %396, %392, %358 : vector<8x32xi1>, vector<8x32xf32>
    %398 = vector.shape_cast %394 : vector<8x1xi1> to vector<8x1xi1>
    %399 = vector.broadcast %398 : vector<8x1xi1> to vector<8x32xi1>
    %400 = arith.select %399, %390, %361 : vector<8x32xi1>, vector<8x32xf32>
    %c10_i32 = arith.constant 10 : i32
    %c8_i32_73 = arith.constant 8 : i32
    %401 = arith.muli %c10_i32, %c8_i32_73 : i32
    %402 = tpu.assume_multiple %401, 8 : i32
    %403 = arith.index_cast %402 : i32 to index
    %c0_74 = arith.constant 0 : index
    %404 = vector.load %arg9[%403, %c0_74] : memref<96x128xf32, #tpu.memory_space<vmem>>, vector<8x128xf32>
    %cst_75 = arith.constant dense<0.000000e+00> : vector<8x128xf32>
    %405 = tpu.matmul %397, %7, %cst_75 {dimension_numbers = #tpu.dot_dimension_numbers<[1], [0], [0], [1], [0, 0, 1, 1], [], []>} : vector<8x32xf32>, vector<32x128xf32>, vector<8x128xf32> -> vector<8x128xf32>
    %406 = arith.addf %404, %405 : vector<8x128xf32>
    %407 = vector.extract_strided_slice %406 {offsets = [0, 0], sizes = [8, 32], strides = [1, 1]} : vector<8x128xf32> to vector<8x32xf32>
    %408 = arith.negf %407 : vector<8x32xf32>
    %409 = math.exp %408 : vector<8x32xf32>
    %cst_76 = arith.constant 1.000000e+00 : f32
    %410 = vector.broadcast %cst_76 : f32 to vector<8x32xf32>
    %411 = arith.addf %410, %409 : vector<8x32xf32>
    %412 = arith.divf %410, %411 : vector<8x32xf32>
    %413 = vector.extract_strided_slice %406 {offsets = [0, 32], sizes = [8, 32], strides = [1, 1]} : vector<8x128xf32> to vector<8x32xf32>
    %414 = arith.negf %413 : vector<8x32xf32>
    %415 = math.exp %414 : vector<8x32xf32>
    %cst_77 = arith.constant 1.000000e+00 : f32
    %416 = vector.broadcast %cst_77 : f32 to vector<8x32xf32>
    %417 = arith.addf %416, %415 : vector<8x32xf32>
    %418 = arith.divf %416, %417 : vector<8x32xf32>
    %419 = vector.extract_strided_slice %406 {offsets = [0, 64], sizes = [8, 32], strides = [1, 1]} : vector<8x128xf32> to vector<8x32xf32>
    %420 = math.tanh %419 : vector<8x32xf32>
    %421 = vector.extract_strided_slice %406 {offsets = [0, 96], sizes = [8, 32], strides = [1, 1]} : vector<8x128xf32> to vector<8x32xf32>
    %422 = arith.negf %421 : vector<8x32xf32>
    %423 = math.exp %422 : vector<8x32xf32>
    %cst_78 = arith.constant 1.000000e+00 : f32
    %424 = vector.broadcast %cst_78 : f32 to vector<8x32xf32>
    %425 = arith.addf %424, %423 : vector<8x32xf32>
    %426 = arith.divf %424, %425 : vector<8x32xf32>
    %427 = arith.mulf %418, %400 : vector<8x32xf32>
    %428 = arith.mulf %412, %420 : vector<8x32xf32>
    %429 = arith.addf %427, %428 : vector<8x32xf32>
    %430 = math.tanh %429 : vector<8x32xf32>
    %431 = arith.mulf %426, %430 : vector<8x32xf32>
    %432 = vector.broadcast %c10_i32 : i32 to vector<8x1xi32>
    %433 = arith.cmpi sgt, %8, %432 : vector<8x1xi32>
    %434 = vector.shape_cast %433 : vector<8x1xi1> to vector<8x1xi1>
    %435 = vector.broadcast %434 : vector<8x1xi1> to vector<8x32xi1>
    %436 = arith.select %435, %431, %397 : vector<8x32xi1>, vector<8x32xf32>
    %437 = vector.shape_cast %433 : vector<8x1xi1> to vector<8x1xi1>
    %438 = vector.broadcast %437 : vector<8x1xi1> to vector<8x32xi1>
    %439 = arith.select %438, %429, %400 : vector<8x32xi1>, vector<8x32xf32>
    %c11_i32 = arith.constant 11 : i32
    %c8_i32_79 = arith.constant 8 : i32
    %440 = arith.muli %c11_i32, %c8_i32_79 : i32
    %441 = tpu.assume_multiple %440, 8 : i32
    %442 = arith.index_cast %441 : i32 to index
    %c0_80 = arith.constant 0 : index
    %443 = vector.load %arg9[%442, %c0_80] : memref<96x128xf32, #tpu.memory_space<vmem>>, vector<8x128xf32>
    %cst_81 = arith.constant dense<0.000000e+00> : vector<8x128xf32>
    %444 = tpu.matmul %436, %7, %cst_81 {dimension_numbers = #tpu.dot_dimension_numbers<[1], [0], [0], [1], [0, 0, 1, 1], [], []>} : vector<8x32xf32>, vector<32x128xf32>, vector<8x128xf32> -> vector<8x128xf32>
    %445 = arith.addf %443, %444 : vector<8x128xf32>
    %446 = vector.extract_strided_slice %445 {offsets = [0, 0], sizes = [8, 32], strides = [1, 1]} : vector<8x128xf32> to vector<8x32xf32>
    %447 = arith.negf %446 : vector<8x32xf32>
    %448 = math.exp %447 : vector<8x32xf32>
    %cst_82 = arith.constant 1.000000e+00 : f32
    %449 = vector.broadcast %cst_82 : f32 to vector<8x32xf32>
    %450 = arith.addf %449, %448 : vector<8x32xf32>
    %451 = arith.divf %449, %450 : vector<8x32xf32>
    %452 = vector.extract_strided_slice %445 {offsets = [0, 32], sizes = [8, 32], strides = [1, 1]} : vector<8x128xf32> to vector<8x32xf32>
    %453 = arith.negf %452 : vector<8x32xf32>
    %454 = math.exp %453 : vector<8x32xf32>
    %cst_83 = arith.constant 1.000000e+00 : f32
    %455 = vector.broadcast %cst_83 : f32 to vector<8x32xf32>
    %456 = arith.addf %455, %454 : vector<8x32xf32>
    %457 = arith.divf %455, %456 : vector<8x32xf32>
    %458 = vector.extract_strided_slice %445 {offsets = [0, 64], sizes = [8, 32], strides = [1, 1]} : vector<8x128xf32> to vector<8x32xf32>
    %459 = math.tanh %458 : vector<8x32xf32>
    %460 = vector.extract_strided_slice %445 {offsets = [0, 96], sizes = [8, 32], strides = [1, 1]} : vector<8x128xf32> to vector<8x32xf32>
    %461 = arith.negf %460 : vector<8x32xf32>
    %462 = math.exp %461 : vector<8x32xf32>
    %cst_84 = arith.constant 1.000000e+00 : f32
    %463 = vector.broadcast %cst_84 : f32 to vector<8x32xf32>
    %464 = arith.addf %463, %462 : vector<8x32xf32>
    %465 = arith.divf %463, %464 : vector<8x32xf32>
    %466 = arith.mulf %457, %439 : vector<8x32xf32>
    %467 = arith.mulf %451, %459 : vector<8x32xf32>
    %468 = arith.addf %466, %467 : vector<8x32xf32>
    %469 = math.tanh %468 : vector<8x32xf32>
    %470 = arith.mulf %465, %469 : vector<8x32xf32>
    %471 = vector.broadcast %c11_i32 : i32 to vector<8x1xi32>
    %472 = arith.cmpi sgt, %8, %471 : vector<8x1xi32>
    %473 = vector.shape_cast %472 : vector<8x1xi1> to vector<8x1xi1>
    %474 = vector.broadcast %473 : vector<8x1xi1> to vector<8x32xi1>
    %475 = arith.select %474, %470, %436 : vector<8x32xi1>, vector<8x32xf32>
    %476 = vector.shape_cast %472 : vector<8x1xi1> to vector<8x1xi1>
    %477 = vector.broadcast %476 : vector<8x1xi1> to vector<8x32xi1>
    %478 = arith.select %477, %468, %439 : vector<8x32xi1>, vector<8x32xf32>
    %c12_i32 = arith.constant 12 : i32
    %c0_85 = arith.constant 0 : index
    %c0_86 = arith.constant 0 : index
    %479 = vector.load %arg6[%c0_85, %c0_86] : memref<1x32xf32, #tpu.memory_space<vmem>>, vector<1x32xf32>
    %480 = vector.broadcast %479 : vector<1x32xf32> to vector<8x32xf32>
    %481 = arith.mulf %475, %480 : vector<8x32xf32>
    %cst_87 = arith.constant dense<0.000000e+00> : vector<8xf32>
    %482 = vector.multi_reduction <add>, %481, %cst_87 [1] : vector<8x32xf32> to vector<8xf32>
    %483 = vector.shape_cast %482 : vector<8xf32> to vector<8x1xf32>
    %c0_88 = arith.constant 0 : index
    %c0_89 = arith.constant 0 : index
    %484 = vector.load %arg7[%c0_88, %c0_89] : memref<1x1xf32, #tpu.memory_space<vmem>>, vector<1x1xf32>
    %485 = vector.broadcast %484 : vector<1x1xf32> to vector<8x1xf32>
    %486 = arith.addf %483, %485 : vector<8x1xf32>
    %c0_90 = arith.constant 0 : index
    %c0_91 = arith.constant 0 : index
    %487 = vector.load %arg8[%c0_90, %c0_91] : memref<8x1xf32, #tpu.memory_space<vmem>>, vector<8x1xf32>
    tpu.vector_store %arg8[%c0_90, %c0_91], %486 {strides = array<i32>} : memref<8x1xf32, #tpu.memory_space<vmem>>, vector<8x1xf32>,
    return
  }
  func.func @transform_0(%arg0: i32) -> (i32, i32) {
    %c0_i32 = arith.constant 0 : i32
    %c0_i32_0 = arith.constant 0 : i32
    %c0_i32_1 = arith.constant 0 : i32
    return %c0_i32, %c0_i32_0 : i32, i32
  }
  func.func @transform_1(%arg0: i32) -> (i32, i32) {
    %c0_i32 = arith.constant 0 : i32
    %c0_i32_0 = arith.constant 0 : i32
    %c0_i32_1 = arith.constant 0 : i32
    return %c0_i32, %c0_i32_0 : i32, i32
  }
  func.func @transform_2(%arg0: i32) -> (i32, i32) {
    %c0_i32 = arith.constant 0 : i32
    %c0_i32_0 = arith.constant 0 : i32
    %c0_i32_1 = arith.constant 0 : i32
    return %c0_i32, %c0_i32_0 : i32, i32
  }
  func.func @transform_3(%arg0: i32) -> (i32, i32) {
    %c0_i32 = arith.constant 0 : i32
    %c0_i32_0 = arith.constant 0 : i32
    %c0_i32_1 = arith.constant 0 : i32
    return %c0_i32, %c0_i32_0 : i32, i32
  }
  func.func @transform_4(%arg0: i32) -> (i32, i32) {
    %c0_i32 = arith.constant 0 : i32
    %c0_i32_0 = arith.constant 0 : i32
    %c0_i32_1 = arith.constant 0 : i32
    return %c0_i32, %c0_i32_0 : i32, i32
  }
  func.func @transform_5(%arg0: i32) -> (i32, i32) {
    %c0_i32 = arith.constant 0 : i32
    %c0_i32_0 = arith.constant 0 : i32
    %c0_i32_1 = arith.constant 0 : i32
    return %c0_i32, %c0_i32_0 : i32, i32
  }
  func.func @transform_6(%arg0: i32) -> (i32, i32) {
    %c0_i32 = arith.constant 0 : i32
    %c0_i32_0 = arith.constant 0 : i32
    %c0_i32_1 = arith.constant 0 : i32
    return %c0_i32, %c0_i32_0 : i32, i32
  }
  func.func @transform_7(%arg0: i32) -> (i32, i32) {
    %c0_i32 = arith.constant 0 : i32
    %c0_i32_0 = arith.constant 0 : i32
    %c0_i32_1 = arith.constant 0 : i32
    return %c0_i32, %c0_i32_0 : i32, i32
  }
}

</mosaic_0001>

<bundles_post_ra>
// kernel: tpu_custom_call.1
= control target key start
LH: loop header
LB: loop body
LE: loop exit
PB: predicated region body
PF: predicated region fallthrough
CT: control target
= control target key end

     0   :  { %v1953_v2 = vmov 0.0   ;;  %vm1954_vm0 = vmmov 0   ;;  %vm51_vm1 = vcmask 261120   ;;  %v1955_v11 = vmov 0   ;;  %s2375_s2 = inlined_call_operand.vmem [shape: f32[32,128], index: 2, kind: input, shape index: {}]   ;;  %s2376_s3 = inlined_call_operand.vmem [shape: f32[32,128], index: 3, kind: input, shape index: {}]   ;;  %s2377_s0 = inlined_call_operand.vmem [shape: f32[96,32], index: 0, kind: input, shape index: {}]   ;;  %s2378_s1 = inlined_call_operand.vmem [shape: s32[8,1], index: 1, kind: input, shape index: {}]   ;;  %s2379_s4 = inlined_call_operand.vmem [shape: f32[1,128], index: 4, kind: input, shape index: {}]   ;;  %s2380_s5 = inlined_call_operand.vmem [shape: f32[1,32], index: 5, kind: input, shape index: {}]   ;;  %s2381_s6 = inlined_call_operand.<no memory space> [shape: f32[1,1], index: 6, kind: input, shape index: {}]   ;;  %s2382_s7 = inlined_call_operand.vmem [shape: f32[8,1], index: 7, kind: output, shape index: {}]  }
   0x1   :  { %v43_v0 = vld [vmem:[%s2375_s2 + $0x18] sm:$0xff]  ;;  %v42_v1 = vld [vmem:[%s2375_s2 + $0x10] sm:$0xff]  ;;  %1717 = vmatprep.subr.mxu1 %v1953_v2  ;;  %1725 = vmatprep.mubr.msk.f32.mxu1 %vm1954_vm0, %v1953_v2  ;;  %v41_v5 = vld [vmem:[%s2375_s2 + $0x8] sm:$0xff] }
   0x2   :  { %v2009_v3 = vld [vmem:[%s2376_s3 + $0x18] sm:$0xff]  ;;  %1691 = vmatprep.subr.mxu0 %v43_v0  ;;  %v2017_v4 = vld [vmem:[%s2376_s3 + $0x10] sm:$0xff]  ;;  %v28_v6 = vld [vmem:[%s2377_s0] sm:$0xff]  ;;  %1855 = vset.pattern.permute.xlu1 %v1955_v11 }
   0x3   :  { %1718 = vmatpush3.msra.mxu1 %v2009_v3  ;;  %1692 = vmatpush3.msra.mxu0 %v43_v0  ;;  %v2030_v7 = vld [vmem:[%s2376_s3 + $0x8] sm:$0xff]  ;;  %v40_v8 = vld [vmem:[%s2375_s2] sm:$0xff]  ;;  %v30_v53 = vld [vmem:[%s2377_s0 + $0x10] sm:$0xff]  ;;  %s1958_s2 = smov 96  }
   0x4   :  { %1719 = vmatprep.subr.mxu1 %v1953_v2  ;;  %1693 = vmatprep.subr.mxu0 %v42_v1  ;;  %v2040_v9 = vld [vmem:[%s2376_s3] sm:$0xff]  ;;  %v29_v10 = vld [vmem:[%s2377_s0 + $0x8] sm:$0xff]  ;;  %v31_v54 = vld [vmem:[%s2377_s0 + $0x18] sm:$0xff] }
   0x5   :  { %1720 = vmatpush3.msra.mxu1 %v2017_v4  ;;  %1694 = vmatpush3.msra.mxu0 %v42_v1  ;;  %v2074_v12 = vld [vmem:[%s2378_s1] sm:$0xff]  ;;  %s1956_s1 = smov 64  }
   0x6   :  { %1721 = vmatprep.subr.mxu1 %v1953_v2  ;;  %1695 = vmatprep.subr.mxu0 %v41_v5  ;;  %vm329_vm2 = vcmp.gt.s32.totalorder %v2074_v12, 0  ;;  %v2082_v16 = vld [vmem:[%s2379_s4] ss:$0 sm:$0xff]  ;;  %s1957_s4 = smov 32   ;;  %vm439_vm4 = vcmp.gt.s32.totalorder %v2074_v12, 1  ;;  %vm549_vm6 = vcmp.gt.s32.totalorder %v2074_v12, 2 }
   0x7   :  { %1699 = vmatprep.mubr.msk.f32.mxu0 %vm51_vm1, %v28_v6  ;;  %1696 = vmatpush3.msra.mxu0 %v41_v5  ;;  %v330_v13 = vsel %vm329_vm2, 1, %v1955_v11  ;;  %v440_v42 = vsel %vm439_vm4, 1, %v1955_v11  ;;  %vm659_vm8 = vcmp.gt.s32.totalorder %v2074_v12, 3  ;;  %vm769_vm10 = vcmp.gt.s32.totalorder %v2074_v12, 4 }
   0x8   :  { %1722 = vmatpush3.msra.mxu1 %v2030_v7  ;;  %1697 = vmatprep.subr.mxu0 %v40_v8  ;;  %vm879_vm12 = vcmp.gt.s32.totalorder %v2074_v12, 5  ;;  %vm989_vm14 = vcmp.gt.s32.totalorder %v2074_v12, 6  ;;  %vm1099_vm2 = vcmp.gt.s32.totalorder %v2074_v12, 7  ;;  %vm1209_vm4 = vcmp.gt.s32.totalorder %v2074_v12, 8 }
   0x9   :  { %1723 = vmatprep.subr.mxu1 %v1953_v2  ;;  %1698 = vmatpush3.msra.mxu0 %v40_v8  ;;  %v550_v8 = vsel %vm549_vm6, 1, %v1955_v11 }
   0xa   :  { %1724 = vmatpush3.msra.mxu1 %v2040_v9  ;;  %1700 = vmatmul.mubr.msk.f32.vlgmr.msra.gmra.mxu0 %vm51_vm1, %v29_v10 }
   0xb   :  { %1726 = vmatmul.mubr.f32.vlgmr.msra.gmra.mxu1 %v1953_v2  ;;  %1728 = vmatprep.subr.mxu1 %v1953_v2 }
   0xc   :  { %1736 = vmatprep.mubr.msk.f32.mxu1 %vm1954_vm0, %v1953_v2  ;;  %1729 = vmatpush3.msra.mxu1 %v2009_v3 }
   0xd   :  { %1750 = vmatprep.subr.mxu0 %v1953_v2  ;;  %1730 = vmatprep.subr.mxu1 %v1953_v2 }
   0xe   :  { %1751 = vmatpush3.msra.mxu0 %v2009_v3  ;;  %1731 = vmatpush3.msra.mxu1 %v2017_v4 }
   0xf   :  { %1752 = vmatprep.subr.mxu0 %v1953_v2  ;;  %1732 = vmatprep.subr.mxu1 %v1953_v2 }
  0x10   :  { %1753 = vmatpush3.msra.mxu0 %v2017_v4  ;;  %1733 = vmatpush3.msra.mxu1 %v2030_v7 }
  0x11   :  { %1754 = vmatprep.subr.mxu0 %v1953_v2  ;;  %1734 = vmatprep.subr.mxu1 %v1953_v2 }
  0x12   :  { %1755 = vmatpush3.msra.mxu0 %v2030_v7  ;;  %1735 = vmatpush3.msra.mxu1 %v2040_v9 }
  0x13   :  { %1756 = vmatprep.subr.mxu0 %v1953_v2  ;;  %1739 = vmatprep.subr.mxu1 %v1953_v2 }
  0x14   :  { %1757 = vmatpush3.msra.mxu0 %v2040_v9  ;;  %1856 = vset.pattern.permute.xlu0 %v1955_v11 }
  0x15   :  { %1772 = vmatprep.subr.mxu0 %v1953_v2  ;;  %332 = vperm.xlu1 %1855, %v330_v13  }
  0x16   :  { %1702 = vmatprep.mubr.msk.f32.mxu0 %vm51_vm1, %v30_v53 }
  0x17   :  { %1703 = vmatmul.mubr.msk.f32.gmra.mxu0 %vm51_vm1, %v31_v54 }
  0x90   :  { %v333_v32 = vpop.permute.xlu1 %332 }
  0x91   :  { %vm334_vm3 = vcmp.eq.s32.totalorder %v333_v32, 1 }
  0xca   :  { %v1701_v14 = vpop.f32.mrf.mxu0 }
  0xcb   :  { %v300_v15 = vpop.f32.mrf.mxu1  ;;  %v160_v37 = vadd.f32 %v1701_v14, %v2082_v16 }
  0xcc   :  { %v154_v17 = vpop.f32.mrf.mxu0 }
  0xcd   :  { %v1727_v18 = vpop.f32.mrf.mxu1  ;;  %v155_v19 = vadd.f32 %v2082_v16, %v154_v17 }
  0xcf   :  { %v304_v20 = vadd.f32 %v300_v15, %v155_v19 }
  0xd1   :  { %1857 = vtanh.f32 %v304_v20  ;;  %v1590_v22 = vmul.f32 -1.442695, %v304_v20 }
  0xd3   :  { %1859 = vpow2.f32 %v1590_v22 }
  0xd7   :  { %v2132_v61 = vpop.f32.mrf.mxu0 }
  0xd9   :  { %v164_v62 = vpop.f32.mrf.mxu0 }
  0xda   :  { %v165_v63 = vadd.f32 %v2082_v16, %v164_v62 }
  0xde   :  { %v1858_v21 = vpop.eup %1857 }
  0xdf   :  { %314 = vrot.lane.b32.xlu0 %v1858_v21, %s1956_s1 }
  0xe0   :  { %v1860_v23 = vpop.eup %1859 }
  0xe1   :  { %v308_v24 = vadd.f32 1.0, %v1860_v23  ;;  %v32_v23 = vld [vmem:[%s2377_s0 + $0x20] sm:$0xff] }
  0xe2   :  { %1705 = vmatprep.mubr.msk.f32.mxu0 %vm51_vm1, %v32_v23 }
  0xe3   :  { %1861 = vrcp.f32 %v308_v24  ;;  %v33_v24 = vld [vmem:[%s2377_s0 + $0x28] sm:$0xff] }
  0xe4   :  { %1706 = vmatmul.mubr.msk.f32.gmra.mxu0 %vm51_vm1, %v33_v24 }
  0xf0   :  { %v1862_v25 = vpop.eup %1861 }
  0xf1   :  { %v312_v28 = vmul.f32 0.0, %v1862_v25 }
 0x151   :  { %v315_v26 = vpop.permute.xlu0 %314 }
 0x152   :  { %v317_v27 = vmul.f32 %v1862_v25, %v315_v26  ;;  %v35_v26 = vld [vmem:[%s2377_s0 + $0x38] sm:$0xff] }
 0x154   :  { %319 = vrot.lane.b32.xlu0 %v317_v27, %s1957_s4  ;;  %v36_v27 = vld [vmem:[%s2377_s0 + $0x40] sm:$0xff] }
 0x1c6   :  { %v320_v29 = vpop.permute.xlu0 %319 }
 0x1c7   :  { %v322_v30 = vadd.f32 %v320_v29, %v312_v28  ;;  %v37_v28 = vld [vmem:[%s2377_s0 + $0x48] sm:$0xff]  ;;  %v38_v29 = vld [vmem:[%s2377_s0 + $0x50] sm:$0xff] }
 0x1c9   :  { %1863 = vtanh.f32 %v322_v30  ;;  %v336_v49 = vsel %vm334_vm3, %v322_v30, 0.0 }
 0x1d6   :  { %v1864_v31 = vpop.eup %1863 }
 0x1d7   :  { %325 = vrot.lane.b32.xlu1 %v1864_v31, %s1956_s1  ;;  %v39_v31 = vld [vmem:[%s2377_s0 + $0x58] sm:$0xff] }
 0x249   :  { %v326_v33 = vpop.permute.xlu1 %325 }
 0x24a   :  { %v328_v34 = vmul.f32 %v1862_v25, %v326_v33  ;;  %v34_v25 = vld [vmem:[%s2377_s0 + $0x30] sm:$0xff] }
 0x24b   :  { %1708 = vmatprep.mubr.msk.f32.mxu0 %vm51_vm1, %v34_v25 }
 0x24c   :  { %v335_v35 = vsel %vm334_vm3, %v328_v34, 0.0  ;;  %1709 = vmatmul.mubr.msk.f32.gmra.mxu0 %vm51_vm1, %v35_v26 }
 0x24d   :  { %340 = vrot.lane.b32.xlu0 %v335_v35, %s1957_s4  ;;  %1711 = vmatprep.mubr.msk.f32.mxu0 %vm51_vm1, %v36_v27 }
 0x250   :  { %1712 = vmatmul.mubr.msk.f32.gmra.mxu0 %vm51_vm1, %v37_v28 }
 0x251   :  { %1714 = vmatprep.mubr.msk.f32.mxu0 %vm51_vm1, %v38_v29 }
 0x254   :  { %1715 = vmatmul.mubr.msk.f32.gmra.mxu0 %vm51_vm1, %v39_v31 }
 0x255   :  { %1758 = vmatprep.mubr.msk.f32.mxu0 %vm1954_vm0, %v1953_v2 }
 0x2bf   :  { %v341_v36 = vpop.permute.xlu0 %340 }
 0x2c0   :  { %1737 = vmatmul.mubr.msk.f32.vlgmr.msra.gmra.mxu1 %vm51_vm1, %v341_v36 }
 0x2c1   :  { %1740 = vmatpush3.msra.mxu1 %v2009_v3  ;;  %1747 = vmatprep.mubr.msk.f32.mxu1 %vm1954_vm0, %v1953_v2 }
 0x2c2   :  { %1741 = vmatprep.subr.mxu1 %v1953_v2 }
 0x2c3   :  { %1742 = vmatpush3.msra.mxu1 %v2017_v4 }
 0x2c4   :  { %1743 = vmatprep.subr.mxu1 %v1953_v2 }
 0x2c5   :  { %1744 = vmatpush3.msra.mxu1 %v2030_v7 }
 0x2c6   :  { %1745 = vmatprep.subr.mxu1 %v1953_v2 }
 0x2c7   :  { %1746 = vmatpush3.msra.mxu1 %v2040_v9 }
 0x2c8   :  { %1761 = vmatprep.subr.mxu1 %v1953_v2 }
 0x380   :  { %v410_v38 = vpop.f32.mrf.mxu1 }
 0x381   :  { %v414_v39 = vadd.f32 %v410_v38, %v160_v37  ;;  %v2195_v37 = vpop.f32.mrf.mxu0 }
 0x382   :  { %v1738_v40 = vpop.f32.mrf.mxu1 }
 0x383   :  { %1865 = vtanh.f32 %v414_v39  ;;  %v1592_v43 = vmul.f32 -1.442695, %v414_v39  ;;  %v174_v38 = vpop.f32.mrf.mxu0 }
 0x385   :  { %1867 = vpow2.f32 %v1592_v43  ;;  %v2197_v39 = vpop.f32.mrf.mxu0 }
 0x387   :  { %v2199_v40 = vpop.f32.mrf.mxu0 }
 0x390   :  { %v1866_v41 = vpop.eup %1865 }
 0x391   :  { %424 = vrot.lane.b32.xlu1 %v1866_v41, %s1956_s1  ;;  %v2201_v41 = vpop.f32.mrf.mxu0 }
 0x392   :  { %v1868_v44 = vpop.eup %1867 }
 0x393   :  { %v418_v45 = vadd.f32 1.0, %v1868_v44 }
 0x395   :  { %442 = vperm.xlu1 %1855, %v440_v42   ;;  %1869 = vrcp.f32 %v418_v45  ;;  %v2203_v42 = vpop.f32.mrf.mxu0  ;;  %v170_v45 = vadd.f32 %v2132_v61, %v2082_v16 }
 0x397   :  { %v2205_v43 = vpop.f32.mrf.mxu0 }
 0x399   :  { %v2207_v44 = vpop.f32.mrf.mxu0 }
 0x3a2   :  { %v1870_v46 = vpop.eup %1869 }
 0x3a3   :  { %v422_v50 = vmul.f32 %v1870_v46, %v336_v49 }
 0x403   :  { %v425_v47 = vpop.permute.xlu1 %424 }
 0x404   :  { %v427_v48 = vmul.f32 %v1870_v46, %v425_v47 }
 0x406   :  { %429 = vrot.lane.b32.xlu0 %v427_v48, %s1957_s4 }
 0x410   :  { %v443_v56 = vpop.permute.xlu1 %442 }
 0x411   :  { %vm444_vm5 = vcmp.eq.s32.totalorder %v443_v56, 1 }
 0x478   :  { %v430_v51 = vpop.permute.xlu0 %429 }
 0x479   :  { %v432_v52 = vadd.f32 %v430_v51, %v422_v50  ;;  %v660_v50 = vsel %vm659_vm8, 1, %v1955_v11 }
 0x47b   :  { %1871 = vtanh.f32 %v432_v52  ;;  %v2140_v19 = vsel %vm444_vm5, %v432_v52, %v336_v49 }
 0x488   :  { %v1872_v55 = vpop.eup %1871 }
 0x489   :  { %435 = vrot.lane.b32.xlu0 %v1872_v55, %s1956_s1 }
 0x4fb   :  { %v436_v57 = vpop.permute.xlu0 %435 }
 0x4fc   :  { %v438_v58 = vmul.f32 %v1870_v46, %v436_v57 }
 0x4fe   :  { %v2117_v59 = vsel %vm444_vm5, %v438_v58, %v335_v35 }
 0x4ff   :  { %450 = vrot.lane.b32.xlu1 %v2117_v59, %s1957_s4 }
 0x571   :  { %v451_v60 = vpop.permute.xlu1 %450 }
 0x572   :  { %1748 = vmatmul.mubr.msk.f32.vlgmr.msra.gmra.mxu1 %vm51_vm1, %v451_v60 }
 0x573   :  { %1762 = vmatpush3.msra.mxu1 %v2009_v3  ;;  %1769 = vmatprep.mubr.msk.f32.mxu1 %vm1954_vm0, %v1953_v2 }
 0x574   :  { %1763 = vmatprep.subr.mxu1 %v1953_v2 }
 0x575   :  { %1764 = vmatpush3.msra.mxu1 %v2017_v4 }
 0x576   :  { %1765 = vmatprep.subr.mxu1 %v1953_v2 }
 0x577   :  { %1766 = vmatpush3.msra.mxu1 %v2030_v7 }
 0x578   :  { %1767 = vmatprep.subr.mxu1 %v1953_v2 }
 0x579   :  { %1768 = vmatpush3.msra.mxu1 %v2040_v9 }
 0x57a   :  { %1783 = vmatprep.subr.mxu1 %v1953_v2 }
 0x632   :  { %v520_v0 = vpop.f32.mrf.mxu1 }
 0x633   :  { %v524_v1 = vadd.f32 %v520_v0, %v165_v63 }
 0x634   :  { %v1749_v5 = vpop.f32.mrf.mxu1 }
 0x635   :  { %1873 = vtanh.f32 %v524_v1  ;;  %v1594_v10 = vmul.f32 -1.442695, %v524_v1 }
 0x637   :  { %1875 = vpow2.f32 %v1594_v10 }
 0x642   :  { %v1874_v6 = vpop.eup %1873 }
 0x643   :  { %534 = vrot.lane.b32.xlu0 %v1874_v6, %s1956_s1  ;;  %v175_v6 = vadd.f32 %v2082_v16, %v174_v38 }
 0x644   :  { %v1876_v13 = vpop.eup %1875 }
 0x645   :  { %v528_v14 = vadd.f32 1.0, %v1876_v13 }
 0x647   :  { %552 = vperm.xlu0 %1856, %v550_v8   ;;  %1877 = vrcp.f32 %v528_v14 }
 0x654   :  { %v1878_v15 = vpop.eup %1877 }
 0x655   :  { %v532_v20 = vmul.f32 %v1878_v15, %v2140_v19 }
 0x6b5   :  { %v535_v17 = vpop.permute.xlu0 %534 }
 0x6b6   :  { %v537_v18 = vmul.f32 %v1878_v15, %v535_v17 }
 0x6b8   :  { %539 = vrot.lane.b32.xlu1 %v537_v18, %s1957_s4 }
 0x6c2   :  { %v553_v32 = vpop.permute.xlu0 %552 }
 0x6c3   :  { %vm554_vm7 = vcmp.eq.s32.totalorder %v553_v32, 1 }
 0x72a   :  { %v540_v21 = vpop.permute.xlu1 %539 }
 0x72b   :  { %v2143_v22 = vadd.f32 %v540_v21, %v532_v20 }
 0x72d   :  { %1879 = vtanh.f32 %v2143_v22  ;;  %v556_v57 = vsel %vm554_vm7, %v2143_v22, %v2140_v19 }
 0x73a   :  { %v1880_v30 = vpop.eup %1879 }
 0x73b   :  { %545 = vrot.lane.b32.xlu1 %v1880_v30, %s1956_s1 }
 0x7ad   :  { %v546_v33 = vpop.permute.xlu1 %545 }
 0x7ae   :  { %v548_v34 = vmul.f32 %v1878_v15, %v546_v33  ;;  %v770_v15 = vsel %vm769_vm10, 1, %v1955_v11  ;;  %v180_v33 = vadd.f32 %v2195_v37, %v2082_v16 }
 0x7b0   :  { %v555_v35 = vsel %vm554_vm7, %v548_v34, %v2117_v59  ;;  %vm1429_vm7 = vcmp.gt.s32.totalorder %v2074_v12, 10 }
 0x7b1   :  { %560 = vrot.lane.b32.xlu1 %v555_v35, %s1957_s4 }
 0x823   :  { %v561_v36 = vpop.permute.xlu1 %560 }
 0x824   :  { %1759 = vmatmul.mubr.msk.f32.vlgmr.msra.gmra.mxu0 %vm51_vm1, %v561_v36 }
 0x825   :  { %1773 = vmatpush3.msra.mxu0 %v2009_v3  ;;  %1780 = vmatprep.mubr.msk.f32.mxu0 %vm1954_vm0, %v1953_v2 }
 0x826   :  { %1774 = vmatprep.subr.mxu0 %v1953_v2 }
 0x827   :  { %1775 = vmatpush3.msra.mxu0 %v2017_v4 }
 0x828   :  { %1776 = vmatprep.subr.mxu0 %v1953_v2 }
 0x829   :  { %1777 = vmatpush3.msra.mxu0 %v2030_v7 }
 0x82a   :  { %1778 = vmatprep.subr.mxu0 %v1953_v2 }
 0x82b   :  { %1779 = vmatpush3.msra.mxu0 %v2040_v9 }
 0x82c   :  { %1794 = vmatprep.subr.mxu0 %v1953_v2 }
 0x8e4   :  { %v630_v46 = vpop.f32.mrf.mxu0 }
 0x8e5   :  { %v634_v47 = vadd.f32 %v630_v46, %v170_v45  ;;  %v880_v45 = vsel %vm879_vm12, 1, %v1955_v11 }
 0x8e6   :  { %v1760_v48 = vpop.f32.mrf.mxu0 }
 0x8e7   :  { %1881 = vtanh.f32 %v634_v47  ;;  %v1596_v51 = vmul.f32 -1.442695, %v634_v47 }
 0x8e9   :  { %1883 = vpow2.f32 %v1596_v51 }
 0x8f4   :  { %v1882_v49 = vpop.eup %1881 }
 0x8f5   :  { %644 = vrot.lane.b32.xlu0 %v1882_v49, %s1956_s1 }
 0x8f6   :  { %v1884_v52 = vpop.eup %1883 }
 0x8f7   :  { %v638_v53 = vadd.f32 1.0, %v1884_v52 }
 0x8f9   :  { %662 = vperm.xlu0 %1856, %v660_v50   ;;  %1885 = vrcp.f32 %v638_v53 }
 0x906   :  { %v1886_v54 = vpop.eup %1885 }
 0x907   :  { %v642_v58 = vmul.f32 %v1886_v54, %v556_v57 }
 0x967   :  { %v645_v55 = vpop.permute.xlu0 %644 }
 0x968   :  { %v647_v56 = vmul.f32 %v1886_v54, %v645_v55 }
 0x96a   :  { %649 = vrot.lane.b32.xlu1 %v647_v56, %s1957_s4 }
 0x974   :  { %v663_v62 = vpop.permute.xlu0 %662 }
 0x975   :  { %vm664_vm9 = vcmp.eq.s32.totalorder %v663_v62, 1 }
 0x9dc   :  { %v650_v59 = vpop.permute.xlu1 %649 }
 0x9dd   :  { %v652_v60 = vadd.f32 %v650_v59, %v642_v58 }
 0x9df   :  { %1887 = vtanh.f32 %v652_v60  ;;  %v666_v23 = vsel %vm664_vm9, %v652_v60, %v556_v57 }
 0x9ec   :  { %v1888_v61 = vpop.eup %1887 }
 0x9ed   :  { %655 = vrot.lane.b32.xlu1 %v1888_v61, %s1956_s1  ;;  %v185_v61 = vadd.f32 %v2082_v16, %v2199_v40 }
 0xa5f   :  { %v656_v63 = vpop.permute.xlu1 %655 }
 0xa60   :  { %v658_v0 = vmul.f32 %v1886_v54, %v656_v63 }
 0xa62   :  { %v665_v1 = vsel %vm664_vm9, %v658_v0, %v555_v35  ;;  %vm1539_vm9 = vcmp.gt.s32.totalorder %v2074_v12, 11 }
 0xa63   :  { %670 = vrot.lane.b32.xlu0 %v665_v1, %s1957_s4 }
 0xad5   :  { %v671_v5 = vpop.permute.xlu0 %670 }
 0xad6   :  { %1770 = vmatmul.mubr.msk.f32.vlgmr.msra.gmra.mxu1 %vm51_vm1, %v671_v5  ;;  %v990_v5 = vsel %vm989_vm14, 1, %v1955_v11 }
 0xad7   :  { %1784 = vmatpush3.msra.mxu1 %v2009_v3  ;;  %1791 = vmatprep.mubr.msk.f32.mxu1 %vm1954_vm0, %v1953_v2 }
 0xad8   :  { %1785 = vmatprep.subr.mxu1 %v1953_v2 }
 0xad9   :  { %1786 = vmatpush3.msra.mxu1 %v2017_v4 }
 0xada   :  { %1787 = vmatprep.subr.mxu1 %v1953_v2 }
 0xadb   :  { %1788 = vmatpush3.msra.mxu1 %v2030_v7 }
 0xadc   :  { %1789 = vmatprep.subr.mxu1 %v1953_v2 }
 0xadd   :  { %1790 = vmatpush3.msra.mxu1 %v2040_v9 }
 0xade   :  { %1805 = vmatprep.subr.mxu1 %v1953_v2 }
 0xb96   :  { %v740_v8 = vpop.f32.mrf.mxu1 }
 0xb97   :  { %v744_v10 = vadd.f32 %v740_v8, %v175_v6 }
 0xb98   :  { %v1771_v13 = vpop.f32.mrf.mxu1 }
 0xb99   :  { %1889 = vtanh.f32 %v744_v10  ;;  %v1598_v17 = vmul.f32 -1.442695, %v744_v10 }
 0xb9b   :  { %1891 = vpow2.f32 %v1598_v17 }
 0xba6   :  { %v1890_v14 = vpop.eup %1889 }
 0xba7   :  { %754 = vrot.lane.b32.xlu1 %v1890_v14, %s1956_s1 }
 0xba8   :  { %v1892_v18 = vpop.eup %1891 }
 0xba9   :  { %v748_v19 = vadd.f32 1.0, %v1892_v18 }
 0xbab   :  { %772 = vperm.xlu1 %1855, %v770_v15   ;;  %1893 = vrcp.f32 %v748_v19 }
 0xbb8   :  { %v1894_v20 = vpop.eup %1893 }
 0xbb9   :  { %v752_v24 = vmul.f32 %v1894_v20, %v666_v23 }
 0xc19   :  { %v755_v21 = vpop.permute.xlu1 %754 }
 0xc1a   :  { %v757_v22 = vmul.f32 %v1894_v20, %v755_v21 }
 0xc1c   :  { %759 = vrot.lane.b32.xlu0 %v757_v22, %s1957_s4 }
 0xc26   :  { %v773_v28 = vpop.permute.xlu1 %772 }
 0xc27   :  { %vm774_vm11 = vcmp.eq.s32.totalorder %v773_v28, 1 }
 0xc8e   :  { %v760_v25 = vpop.permute.xlu0 %759 }
 0xc8f   :  { %v762_v26 = vadd.f32 %v760_v25, %v752_v24 }
 0xc91   :  { %1895 = vtanh.f32 %v762_v26  ;;  %v776_v51 = vsel %vm774_vm11, %v762_v26, %v666_v23  ;;  %v190_v26 = vadd.f32 %v2197_v39, %v2082_v16 }
 0xc9e   :  { %v1896_v27 = vpop.eup %1895 }
 0xc9f   :  { %765 = vrot.lane.b32.xlu0 %v1896_v27, %s1956_s1 }
 0xd11   :  { %v766_v29 = vpop.permute.xlu0 %765 }
 0xd12   :  { %v768_v30 = vmul.f32 %v1894_v20, %v766_v29 }
 0xd14   :  { %v775_v31 = vsel %vm774_vm11, %v768_v30, %v665_v1  ;;  %vm1571_vm11 = vcmask 7168  }
 0xd15   :  { %780 = vrot.lane.b32.xlu1 %v775_v31, %s1957_s4 }
 0xd87   :  { %v781_v32 = vpop.permute.xlu1 %780 }
 0xd88   :  { %1781 = vmatmul.mubr.msk.f32.vlgmr.msra.gmra.mxu0 %vm51_vm1, %v781_v32 }
 0xd89   :  { %1795 = vmatpush3.msra.mxu0 %v2009_v3  ;;  %1802 = vmatprep.mubr.msk.f32.mxu0 %vm1954_vm0, %v1953_v2 }
 0xd8a   :  { %1796 = vmatprep.subr.mxu0 %v1953_v2 }
 0xd8b   :  { %1797 = vmatpush3.msra.mxu0 %v2017_v4 }
 0xd8c   :  { %1798 = vmatprep.subr.mxu0 %v1953_v2 }
 0xd8d   :  { %1799 = vmatpush3.msra.mxu0 %v2030_v7 }
 0xd8e   :  { %1800 = vmatprep.subr.mxu0 %v1953_v2 }
 0xd8f   :  { %1801 = vmatpush3.msra.mxu0 %v2040_v9 }
 0xd90   :  { %1816 = vmatprep.subr.mxu0 %v1953_v2 }
 0xe48   :  { %v850_v34 = vpop.f32.mrf.mxu0 }
 0xe49   :  { %v854_v35 = vadd.f32 %v850_v34, %v180_v33 }
 0xe4a   :  { %v1782_v36 = vpop.f32.mrf.mxu0 }
 0xe4b   :  { %1897 = vtanh.f32 %v854_v35  ;;  %v1600_v46 = vmul.f32 -1.442695, %v854_v35 }
 0xe4d   :  { %1899 = vpow2.f32 %v1600_v46 }
 0xe58   :  { %v1898_v38 = vpop.eup %1897 }
 0xe59   :  { %864 = vrot.lane.b32.xlu0 %v1898_v38, %s1956_s1 }
 0xe5a   :  { %v1900_v47 = vpop.eup %1899 }
 0xe5b   :  { %v858_v48 = vadd.f32 1.0, %v1900_v47 }
 0xe5d   :  { %882 = vperm.xlu0 %1856, %v880_v45   ;;  %1901 = vrcp.f32 %v858_v48 }
 0xe6a   :  { %v1902_v49 = vpop.eup %1901 }
 0xe6b   :  { %v862_v52 = vmul.f32 %v1902_v49, %v776_v51 }
 0xecb   :  { %v865_v50 = vpop.permute.xlu0 %864 }
 0xecc   :  { %v867_v37 = vmul.f32 %v1902_v49, %v865_v50 }
 0xece   :  { %869 = vrot.lane.b32.xlu1 %v867_v37, %s1957_s4 }
 0xed8   :  { %v883_v56 = vpop.permute.xlu0 %882 }
 0xed9   :  { %vm884_vm13 = vcmp.eq.s32.totalorder %v883_v56, 1 }
 0xf40   :  { %v870_v53 = vpop.permute.xlu1 %869 }
 0xf41   :  { %v872_v54 = vadd.f32 %v870_v53, %v862_v52  ;;  %v195_v53 = vadd.f32 %v2082_v16, %v2203_v42 }
 0xf43   :  { %1903 = vtanh.f32 %v872_v54  ;;  %v886_v15 = vsel %vm884_vm13, %v872_v54, %v776_v51 }
 0xf50   :  { %v1904_v55 = vpop.eup %1903 }
 0xf51   :  { %875 = vrot.lane.b32.xlu1 %v1904_v55, %s1956_s1 }
 0xfc3   :  { %v876_v57 = vpop.permute.xlu1 %875 }
 0xfc4   :  { %v878_v58 = vmul.f32 %v1902_v49, %v876_v57 }
 0xfc6   :  { %v885_v59 = vsel %vm884_vm13, %v878_v58, %v775_v31  ;;  %v1100_v31 = vsel %vm1099_vm2, 1, %v1955_v11  ;;  %v1210_v58 = vsel %vm1209_vm4, 1, %v1955_v11 }
 0xfc7   :  { %890 = vrot.lane.b32.xlu0 %v885_v59, %s1957_s4 }
0x1039   :  { %v891_v60 = vpop.permute.xlu0 %890 }
0x103a   :  { %1792 = vmatmul.mubr.msk.f32.vlgmr.msra.gmra.mxu1 %vm51_vm1, %v891_v60 }
0x103b   :  { %1806 = vmatpush3.msra.mxu1 %v2009_v3  ;;  %1813 = vmatprep.mubr.msk.f32.mxu1 %vm1954_vm0, %v1953_v2 }
0x103c   :  { %1807 = vmatprep.subr.mxu1 %v1953_v2 }
0x103d   :  { %1808 = vmatpush3.msra.mxu1 %v2017_v4 }
0x103e   :  { %1809 = vmatprep.subr.mxu1 %v1953_v2 }
0x103f   :  { %1810 = vmatpush3.msra.mxu1 %v2030_v7 }
0x1040   :  { %1811 = vmatprep.subr.mxu1 %v1953_v2 }
0x1041   :  { %1812 = vmatpush3.msra.mxu1 %v2040_v9 }
0x1042   :  { %1827 = vmatprep.subr.mxu1 %v1953_v2 }
0x10fa   :  { %v960_v62 = vpop.f32.mrf.mxu1 }
0x10fb   :  { %v964_v63 = vadd.f32 %v960_v62, %v185_v61 }
0x10fc   :  { %v1793_v0 = vpop.f32.mrf.mxu1 }
0x10fd   :  { %1905 = vtanh.f32 %v964_v63  ;;  %v1602_v6 = vmul.f32 -1.442695, %v964_v63 }
0x10ff   :  { %1907 = vpow2.f32 %v1602_v6 }
0x110a   :  { %v1906_v1 = vpop.eup %1905 }
0x110b   :  { %974 = vrot.lane.b32.xlu1 %v1906_v1, %s1956_s1 }
0x110c   :  { %v1908_v8 = vpop.eup %1907 }
0x110d   :  { %v968_v10 = vadd.f32 1.0, %v1908_v8 }
0x110f   :  { %992 = vperm.xlu1 %1855, %v990_v5   ;;  %1909 = vrcp.f32 %v968_v10 }
0x111c   :  { %v1910_v13 = vpop.eup %1909 }
0x111d   :  { %v972_v17 = vmul.f32 %v1910_v13, %v886_v15 }
0x117d   :  { %v975_v14 = vpop.permute.xlu1 %974 }
0x117e   :  { %v977_v40 = vmul.f32 %v1910_v13, %v975_v14 }
0x1180   :  { %979 = vrot.lane.b32.xlu0 %v977_v40, %s1957_s4 }
0x118a   :  { %v993_v21 = vpop.permute.xlu1 %992 }
0x118b   :  { %vm994_vm15 = vcmp.eq.s32.totalorder %v993_v21, 1 }
0x11f2   :  { %v980_v18 = vpop.permute.xlu0 %979 }
0x11f3   :  { %v982_v19 = vadd.f32 %v980_v18, %v972_v17  ;;  %v200_v17 = vadd.f32 %v2201_v41, %v2082_v16 }
0x11f5   :  { %1911 = vtanh.f32 %v982_v19  ;;  %v996_v38 = vsel %vm994_vm15, %v982_v19, %v886_v15 }
0x1202   :  { %v1912_v20 = vpop.eup %1911 }
0x1203   :  { %985 = vrot.lane.b32.xlu0 %v1912_v20, %s1956_s1 }
0x1275   :  { %v986_v22 = vpop.permute.xlu0 %985 }
0x1276   :  { %v988_v23 = vmul.f32 %v1910_v13, %v986_v22 }
0x1278   :  { %v995_v24 = vsel %vm994_vm15, %v988_v23, %v885_v59 }
0x1279   :  { %1000 = vrot.lane.b32.xlu1 %v995_v24, %s1957_s4 }
0x12eb   :  { %v1001_v25 = vpop.permute.xlu1 %1000 }
0x12ec   :  { %1803 = vmatmul.mubr.msk.f32.vlgmr.msra.gmra.mxu0 %vm51_vm1, %v1001_v25 }
0x12ed   :  { %1817 = vmatpush3.msra.mxu0 %v2009_v3  ;;  %1824 = vmatprep.mubr.msk.f32.mxu0 %vm1954_vm0, %v1953_v2 }
0x12ee   :  { %1818 = vmatprep.subr.mxu0 %v1953_v2 }
0x12ef   :  { %1819 = vmatpush3.msra.mxu0 %v2017_v4 }
0x12f0   :  { %1820 = vmatprep.subr.mxu0 %v1953_v2 }
0x12f1   :  { %1821 = vmatpush3.msra.mxu0 %v2030_v7 }
0x12f2   :  { %1822 = vmatprep.subr.mxu0 %v1953_v2 }
0x12f3   :  { %1823 = vmatpush3.msra.mxu0 %v2040_v9 }
0x12f4   :  { %1838 = vmatprep.subr.mxu0 %v1953_v2 }
0x13ac   :  { %v1070_v27 = vpop.f32.mrf.mxu0 }
0x13ad   :  { %v1074_v28 = vadd.f32 %v1070_v27, %v190_v26 }
0x13ae   :  { %v1804_v29 = vpop.f32.mrf.mxu0 }
0x13af   :  { %1913 = vtanh.f32 %v1074_v28  ;;  %v1604_v32 = vmul.f32 -1.442695, %v1074_v28 }
0x13b1   :  { %1915 = vpow2.f32 %v1604_v32 }
0x13bc   :  { %v1914_v30 = vpop.eup %1913 }
0x13bd   :  { %1084 = vrot.lane.b32.xlu0 %v1914_v30, %s1956_s1 }
0x13be   :  { %v1916_v33 = vpop.eup %1915 }
0x13bf   :  { %v1078_v34 = vadd.f32 1.0, %v1916_v33  ;;  %v205_v33 = vadd.f32 %v2082_v16, %v2207_v44 }
0x13c1   :  { %1102 = vperm.xlu0 %1856, %v1100_v31   ;;  %1917 = vrcp.f32 %v1078_v34 }
0x13ce   :  { %v1918_v35 = vpop.eup %1917 }
0x13cf   :  { %v1082_v45 = vmul.f32 %v1918_v35, %v996_v38 }
0x142f   :  { %v1085_v36 = vpop.permute.xlu0 %1084 }
0x1430   :  { %v1087_v39 = vmul.f32 %v1918_v35, %v1085_v36 }
0x1432   :  { %1089 = vrot.lane.b32.xlu1 %v1087_v39, %s1957_s4 }
0x143c   :  { %v1103_v49 = vpop.permute.xlu0 %1102 }
0x143d   :  { %vm1104_vm3 = vcmp.eq.s32.totalorder %v1103_v49, 1 }
0x14a4   :  { %v1090_v46 = vpop.permute.xlu1 %1089 }
0x14a5   :  { %v1092_v47 = vadd.f32 %v1090_v46, %v1082_v45 }
0x14a7   :  { %1919 = vtanh.f32 %v1092_v47  ;;  %v1106_v0 = vsel %vm1104_vm3, %v1092_v47, %v996_v38  ;;  %v1430_v38 = vsel %vm1429_vm7, 1, %v1955_v11 }
0x14b4   :  { %v1920_v48 = vpop.eup %1919 }
0x14b5   :  { %1095 = vrot.lane.b32.xlu1 %v1920_v48, %s1956_s1 }
0x1527   :  { %v1096_v50 = vpop.permute.xlu1 %1095 }
0x1528   :  { %v1098_v37 = vmul.f32 %v1918_v35, %v1096_v50 }
0x152a   :  { %v1105_v51 = vsel %vm1104_vm3, %v1098_v37, %v995_v24 }
0x152b   :  { %1110 = vrot.lane.b32.xlu0 %v1105_v51, %s1957_s4 }
0x159d   :  { %v1111_v52 = vpop.permute.xlu0 %1110 }
0x159e   :  { %1814 = vmatmul.mubr.msk.f32.vlgmr.msra.gmra.mxu1 %vm51_vm1, %v1111_v52 }
0x159f   :  { %1828 = vmatpush3.msra.mxu1 %v2009_v3  ;;  %1835 = vmatprep.mubr.msk.f32.mxu1 %vm1954_vm0, %v1953_v2 }
0x15a0   :  { %1829 = vmatprep.subr.mxu1 %v1953_v2 }
0x15a1   :  { %1830 = vmatpush3.msra.mxu1 %v2017_v4 }
0x15a2   :  { %1831 = vmatprep.subr.mxu1 %v1953_v2 }
0x15a3   :  { %1832 = vmatpush3.msra.mxu1 %v2030_v7 }
0x15a4   :  { %1833 = vmatprep.subr.mxu1 %v1953_v2 }
0x15a5   :  { %1834 = vmatpush3.msra.mxu1 %v2040_v9 }
0x165e   :  { %v1180_v54 = vpop.f32.mrf.mxu1 }
0x165f   :  { %v1184_v55 = vadd.f32 %v1180_v54, %v195_v53 }
0x1660   :  { %v1815_v56 = vpop.f32.mrf.mxu1 }
0x1661   :  { %1921 = vtanh.f32 %v1184_v55  ;;  %v1606_v59 = vmul.f32 -1.442695, %v1184_v55 }
0x1663   :  { %1923 = vpow2.f32 %v1606_v59  ;;  %v210_v59 = vadd.f32 %v2205_v43, %v2082_v16 }
0x166e   :  { %v1922_v57 = vpop.eup %1921 }
0x166f   :  { %1194 = vrot.lane.b32.xlu1 %v1922_v57, %s1956_s1 }
0x1670   :  { %v1924_v60 = vpop.eup %1923 }
0x1671   :  { %v1188_v61 = vadd.f32 1.0, %v1924_v60 }
0x1673   :  { %1212 = vperm.xlu1 %1855, %v1210_v58   ;;  %1925 = vrcp.f32 %v1188_v61 }
0x1680   :  { %v1926_v62 = vpop.eup %1925 }
0x1681   :  { %v1192_v1 = vmul.f32 %v1926_v62, %v1106_v0 }
0x16e1   :  { %v1195_v63 = vpop.permute.xlu1 %1194 }
0x16e2   :  { %v1197_v42 = vmul.f32 %v1926_v62, %v1195_v63 }
0x16e4   :  { %1199 = vrot.lane.b32.xlu0 %v1197_v42, %s1957_s4  ;;  %v1540_v42 = vsel %vm1539_vm9, 1, %v1955_v11 }
0x16ee   :  { %v1213_v10 = vpop.permute.xlu1 %1212 }
0x16ef   :  { %vm1214_vm5 = vcmp.eq.s32.totalorder %v1213_v10, 1 }
0x1756   :  { %v1200_v5 = vpop.permute.xlu0 %1199 }
0x1757   :  { %v1202_v6 = vadd.f32 %v1200_v5, %v1192_v1 }
0x1759   :  { %1927 = vtanh.f32 %v1202_v6  ;;  %v1216_v23 = vsel %vm1214_vm5, %v1202_v6, %v1106_v0 }
0x1766   :  { %v1928_v8 = vpop.eup %1927 }
0x1767   :  { %1205 = vrot.lane.b32.xlu0 %v1928_v8, %s1956_s1 }
0x17d9   :  { %v1206_v13 = vpop.permute.xlu0 %1205 }
0x17da   :  { %v1208_v14 = vmul.f32 %v1926_v62, %v1206_v13 }
0x17dc   :  { %v1215_v40 = vsel %vm1214_vm5, %v1208_v14, %v1105_v51 }
0x17dd   :  { %1220 = vrot.lane.b32.xlu1 %v1215_v40, %s1957_s4 }
0x184f   :  { %v1221_v15 = vpop.permute.xlu1 %1220 }
0x1850   :  { %1825 = vmatmul.mubr.msk.f32.vlgmr.msra.gmra.mxu0 %vm51_vm1, %v1221_v15 }
0x1851   :  { %1839 = vmatpush3.msra.mxu0 %v2009_v3  ;;  %1846 = vmatprep.mubr.msk.f32.mxu0 %vm1954_vm0, %v1953_v2  ;;  %vm1319_vm0 = vcmp.gt.s32.totalorder %v2074_v12, 9  ;;  %v1613_v12 = vld [vmem:[%s2380_s5] ss:$0 sm:$0xff] }
0x1852   :  { %1840 = vmatprep.subr.mxu0 %v1953_v2 }
0x1853   :  { %1841 = vmatpush3.msra.mxu0 %v2017_v4  ;;  %v1320_v4 = vsel %vm1319_vm0, 1, %v1955_v11 }
0x1854   :  { %1842 = vmatprep.subr.mxu0 %v1953_v2 }
0x1855   :  { %1843 = vmatpush3.msra.mxu0 %v2030_v7 }
0x1856   :  { %1844 = vmatprep.subr.mxu0 %v1953_v2 }
0x1857   :  { %1845 = vmatpush3.msra.mxu0 %v2040_v9 }
0x1910   :  { %v1290_v18 = vpop.f32.mrf.mxu0 }
0x1911   :  { %v1294_v3 = vadd.f32 %v1290_v18, %v200_v17 }
0x1912   :  { %v1826_v19 = vpop.f32.mrf.mxu0 }
0x1913   :  { %1929 = vtanh.f32 %v1294_v3  ;;  %v1608_v7 = vmul.f32 -1.442695, %v1294_v3 }
0x1915   :  { %1931 = vpow2.f32 %v1608_v7 }
0x1920   :  { %v1930_v20 = vpop.eup %1929 }
0x1921   :  { %1304 = vrot.lane.b32.xlu0 %v1930_v20, %s1956_s1 }
0x1922   :  { %v1932_v2 = vpop.eup %1931 }
0x1923   :  { %v1298_v21 = vadd.f32 1.0, %v1932_v2 }
0x1925   :  { %1322 = vperm.xlu0 %1856, %v1320_v4   ;;  %1933 = vrcp.f32 %v1298_v21 }
0x1932   :  { %v1934_v9 = vpop.eup %1933 }
0x1933   :  { %v1302_v24 = vmul.f32 %v1934_v9, %v1216_v23 }
0x1993   :  { %v1305_v22 = vpop.permute.xlu0 %1304 }
0x1994   :  { %v1307_v41 = vmul.f32 %v1934_v9, %v1305_v22 }
0x1996   :  { %1309 = vrot.lane.b32.xlu1 %v1307_v41, %s1957_s4 }
0x19a0   :  { %v1323_v28 = vpop.permute.xlu0 %1322 }
0x19a1   :  { %vm1324_vm6 = vcmp.eq.s32.totalorder %v1323_v28, 1 }
0x1a08   :  { %v1310_v25 = vpop.permute.xlu1 %1309 }
0x1a09   :  { %v1312_v26 = vadd.f32 %v1310_v25, %v1302_v24 }
0x1a0b   :  { %1935 = vtanh.f32 %v1312_v26  ;;  %v1326_v50 = vsel %vm1324_vm6, %v1312_v26, %v1216_v23 }
0x1a18   :  { %v1936_v27 = vpop.eup %1935 }
0x1a19   :  { %1315 = vrot.lane.b32.xlu1 %v1936_v27, %s1956_s1 }
0x1a8b   :  { %v1316_v29 = vpop.permute.xlu1 %1315 }
0x1a8c   :  { %v1318_v30 = vmul.f32 %v1934_v9, %v1316_v29 }
0x1a8e   :  { %v1325_v31 = vsel %vm1324_vm6, %v1318_v30, %v1215_v40  ;;  %v12_v40 = vstv %s2381_s6 }
0x1a8f   :  { %1330 = vrot.lane.b32.xlu0 %v1325_v31, %s1957_s4  ;;  %13 = vst [vmem:[#allocation3] sm:$0x1] %v12_v40 }
0x1a96   :  { %v1614_v2 = vld [vmem:[#allocation3] ss:$0 sm:$0xff] }
0x1b01   :  { %v1331_v32 = vpop.permute.xlu0 %1330 }
0x1b02   :  { %1836 = vmatmul.mubr.msk.f32.vlgmr.msra.gmra.mxu1 %vm51_vm1, %v1331_v32 }
0x1bc2   :  { %v1400_v34 = vpop.f32.mrf.mxu1 }
0x1bc3   :  { %v1404_v35 = vadd.f32 %v1400_v34, %v205_v33 }
0x1bc4   :  { %v1837_v36 = vpop.f32.mrf.mxu1 }
0x1bc5   :  { %1937 = vtanh.f32 %v1404_v35  ;;  %v1610_v45 = vmul.f32 -1.442695, %v1404_v35 }
0x1bc7   :  { %1939 = vpow2.f32 %v1610_v45 }
0x1bd2   :  { %v1938_v39 = vpop.eup %1937 }
0x1bd3   :  { %1414 = vrot.lane.b32.xlu1 %v1938_v39, %s1956_s1 }
0x1bd4   :  { %v1940_v46 = vpop.eup %1939 }
0x1bd5   :  { %v1408_v47 = vadd.f32 1.0, %v1940_v46 }
0x1bd7   :  { %1432 = vperm.xlu1 %1855, %v1430_v38   ;;  %1941 = vrcp.f32 %v1408_v47 }
0x1be4   :  { %v1942_v48 = vpop.eup %1941 }
0x1be5   :  { %v1412_v37 = vmul.f32 %v1942_v48, %v1326_v50 }
0x1c45   :  { %v1415_v49 = vpop.permute.xlu1 %1414 }
0x1c46   :  { %v1417_v44 = vmul.f32 %v1942_v48, %v1415_v49 }
0x1c48   :  { %1419 = vrot.lane.b32.xlu0 %v1417_v44, %s1957_s4 }
0x1c52   :  { %v1433_v54 = vpop.permute.xlu1 %1432 }
0x1c53   :  { %vm1434_vm8 = vcmp.eq.s32.totalorder %v1433_v54, 1 }
0x1cba   :  { %v1420_v51 = vpop.permute.xlu0 %1419 }
0x1cbb   :  { %v1422_v52 = vadd.f32 %v1420_v51, %v1412_v37 }
0x1cbd   :  { %1943 = vtanh.f32 %v1422_v52  ;;  %v1436_v43 = vsel %vm1434_vm8, %v1422_v52, %v1326_v50 }
0x1cca   :  { %v1944_v53 = vpop.eup %1943 }
0x1ccb   :  { %1425 = vrot.lane.b32.xlu0 %v1944_v53, %s1956_s1 }
0x1d3d   :  { %v1426_v55 = vpop.permute.xlu0 %1425 }
0x1d3e   :  { %v1428_v56 = vmul.f32 %v1942_v48, %v1426_v55 }
0x1d40   :  { %v1435_v57 = vsel %vm1434_vm8, %v1428_v56, %v1325_v31 }
0x1d41   :  { %1440 = vrot.lane.b32.xlu1 %v1435_v57, %s1957_s4 }
0x1db3   :  { %v1441_v58 = vpop.permute.xlu1 %1440 }
0x1db4   :  { %1847 = vmatmul.mubr.msk.f32.vlgmr.msra.gmra.mxu0 %vm51_vm1, %v1441_v58 }
0x1e74   :  { %v1510_v60 = vpop.f32.mrf.mxu0 }
0x1e75   :  { %v1514_v61 = vadd.f32 %v1510_v60, %v210_v59 }
0x1e76   :  { %v1848_v62 = vpop.f32.mrf.mxu0 }
0x1e77   :  { %1945 = vtanh.f32 %v1514_v61  ;;  %v1612_v0 = vmul.f32 -1.442695, %v1514_v61 }
0x1e79   :  { %1947 = vpow2.f32 %v1612_v0 }
0x1e84   :  { %v1946_v63 = vpop.eup %1945 }
0x1e85   :  { %1524 = vrot.lane.b32.xlu0 %v1946_v63, %s1956_s1 }
0x1e86   :  { %v1948_v1 = vpop.eup %1947 }
0x1e87   :  { %v1518_v5 = vadd.f32 1.0, %v1948_v1 }
0x1e89   :  { %1542 = vperm.xlu0 %1856, %v1540_v42   ;;  %1949 = vrcp.f32 %v1518_v5 }
0x1e8d   :  { %1552 = vrot.lane.b32.xlu0 %v1613_v12, %s1958_s2 }
0x1e96   :  { %v1950_v6 = vpop.eup %1949 }
0x1e97   :  { %v1522_v11 = vmul.f32 %v1950_v6, %v1436_v43 }
0x1ef7   :  { %v1525_v8 = vpop.permute.xlu0 %1524 }
0x1ef8   :  { %v1527_v16 = vmul.f32 %v1950_v6, %v1525_v8 }
0x1efa   :  { %1529 = vrot.lane.b32.xlu1 %v1527_v16, %s1957_s4 }
0x1f04   :  { %v1543_v15 = vpop.permute.xlu0 %1542 }
0x1f05   :  { %vm1544_vm10 = vcmp.eq.s32.totalorder %v1543_v15, 1 }
0x1f08   :  { %v1553_v3 = vpop.permute.xlu0 %1552 }
0x1f6c   :  { %v1530_v10 = vpop.permute.xlu1 %1529 }
0x1f6d   :  { %v1532_v13 = vadd.f32 %v1530_v10, %v1522_v11 }
0x1f6f   :  { %1951 = vtanh.f32 %v1532_v13 }
0x1f7c   :  { %v1952_v14 = vpop.eup %1951 }
0x1f7d   :  { %1535 = vrot.lane.b32.xlu1 %v1952_v14, %s1956_s1 }
0x1fef   :  { %v1536_v17 = vpop.permute.xlu1 %1535 }
0x1ff0   :  { %v1538_v18 = vmul.f32 %v1950_v6, %v1536_v17 }
0x1ff2   :  { %v1545_v19 = vsel %vm1544_vm10, %v1538_v18, %v1435_v57 }
0x1ff3   :  { %v1555_v20 = vmul.f32 %v1553_v3, %v1545_v19 }
0x1ff5   :  { %1557 = vrot.lane.b32.xlu1 %v1555_v20, %s1957_s4 }
0x2067   :  { %v1558_v4 = vpop.permute.xlu1 %1557 }
0x2068   :  { %v1560_v7 = vsel %vm51_vm1, %v1558_v4, 0.0 }
0x2069   :  { %1561 = vadd.xlane.f32.xlu0 %v1560_v7 }
0x20f2   :  { %v1562_v21 = vpop.xlane.xlu0 %1561 }
0x20f3   :  { %v1570_v9 = vadd.f32 %v1614_v2, %v1562_v21 }
0x20f5   :  { %1572 = vst.msk [vmem:[%s2382_s7] sm:$0xff] %vm1571_vm11, %v1570_v9 }

</bundles_post_ra>
